<compile_context>
chip_gen: v5e
topology: v5e:2x2
jax: 0.10.0
libtpu: 0.0.40
codegen_flags: <defaults>
</compile_context>

<pallas_src>
import math

import jax
import jax.numpy as jnp
from jax.experimental import pallas as pl
from jax.experimental.pallas import tpu as pltpu


def _round_up(x, m):
    return ((x + m - 1) // m) * m


def _fusion_kernel(seq_ref, desc_ref,
                   wv_ref, bv_ref, wo_seq_ref, wo_ctx_ref, bo_ref,
                   out_ref):
    Bt, Lb, S = seq_ref.shape
    D = out_ref.shape[-1]

    # Descriptor path (once per batch element): uniform softmax => context is
    # exactly the value projection; then route it through Wo's context slice.
    v = jnp.dot(desc_ref[...], wv_ref[...],
                preferred_element_type=jnp.float32) + bv_ref[...]        # (Bt, D)
    ctx = jnp.dot(v, wo_ctx_ref[...],
                  preferred_element_type=jnp.float32) + bo_ref[...]      # (Bt, D)

    # Sequence path: fold (Bt, Lb) into the MXU M dimension with a free
    # re-layout (Lb % 8 == 0), one big matmul, fold back.
    seq2 = seq_ref[...].reshape(Bt * Lb, S)
    seq_out = jnp.dot(seq2, wo_seq_ref[...],
                      preferred_element_type=jnp.float32)                # (Bt*Lb, D)

    # Broadcast-add ctx over the sequence (sublane) axis -- pure VPU work,
    # replaces the previous O(Bt^2) one-hot scatter matmul.
    out = seq_out.reshape(Bt, Lb, D) + ctx[:, None, :]
    out_ref[...] = out.astype(out_ref.dtype)


def feature_fusion(seq_features, desc_features, params, *, output_dim,
                   rows_per_step=2048, vmem_target_bytes=12 * 2**20):
    """seq_features: (B, L, S) f32, desc_features: (B, Ddesc) f32 -> (B, L, D)."""
    B, L, S = seq_features.shape
    Ddesc = desc_features.shape[1]
    D = output_dim
    dtype = seq_features.dtype
    itemsize = seq_features.dtype.itemsize

    # ---- choose tiling ----------------------------------------------------
    # Double-buffered seq+out blocks dominate VMEM; cap the folded row count.
    bytes_per_row = (S + D) * itemsize
    rows_cap = max(8, vmem_target_bytes // (2 * bytes_per_row))
    rows_blk = max(8, min(rows_per_step, rows_cap))

    L8 = _round_up(L, 8)                      # sublane-clean sequence length

    if 8 * L8 <= rows_blk:
        # Short/medium sequences: whole sequence per block, fold batch elems.
        Lblk, nl = L8, 1
        block_batch = max(8, (rows_blk // L8) // 8 * 8)
        if B >= 16:      # keep >=2 grid steps so both v7x TensorCores work
            block_batch = min(block_batch, _round_up(pl.cdiv(B, 2), 8))
        block_batch = min(block_batch, _round_up(B, 8))
    else:
        # Long sequences: minimum batch block, tile the sequence dimension so
        # the per-step footprint stays bounded (protects v5e/v7x VMEM).
        block_batch = 8
        lblk_max = max(8, (rows_blk // block_batch) // 8 * 8)
        nl = pl.cdiv(L8, lblk_max)
        Lblk = _round_up(pl.cdiv(L8, nl), 8)
    Lp = nl * Lblk

    nb = pl.cdiv(B, block_batch)
    Bp = nb * block_batch

    # ---- pad (rows are independent; padded rows are sliced off afterwards;
    # padded batch rows do receive a bias-only ctx value, which is discarded).
    if Lp != L:
        seq_features = jnp.pad(seq_features, ((0, 0), (0, Lp - L), (0, 0)))
    if Bp != B:
        seq_features = jnp.pad(seq_features, ((0, Bp - B), (0, 0), (0, 0)))
        desc_features = jnp.pad(desc_features, ((0, Bp - B), (0, 0)))

    # wq/bq/wk/bk are mathematically dead in this forward (uniform softmax).
    wv, bv = params["wv"], params["bv"]            # (Ddesc, D), (D,)
    wo, bo = params["wo"], params["bo"]            # (S + D, D), (D,)
    wo_seq = wo[:S]                                # (S, D)
    wo_ctx = wo[S:]                                # (D, D)
    bv2 = bv.reshape(1, D)
    bo2 = bo.reshape(1, D)

    # ---- VMEM budget & cost hint -------------------------------------------
    blk_in = block_batch * Lblk * S * itemsize
    blk_out = block_batch * Lblk * D * itemsize
    blk_desc = block_batch * Ddesc * itemsize
    w_bytes = (Ddesc * D + S * D + D * D + 2 * D) * 4
    vmem_needed = 2 * (blk_in + blk_out + blk_desc) + 2 * w_bytes
    vmem_limit = int(min(56 * 2**20, max(24 * 2**20, 2 * vmem_needed)))

    flops = (2 * Bp * Lp * S * D                       # sequence projection
             + 2 * Bp * nl * (Ddesc * D + D * D)       # descriptor path
             + Bp * Lp * D)                            # broadcast add
    bytes_accessed = (itemsize * Bp * Lp * (S + D)
                      + itemsize * Bp * nl * Ddesc
                      + 4 * (Ddesc * D + (S + D) * D + 2 * D))

    def _const_spec(shape, single_buffer):
        if len(shape) == 2:
            idx = lambda b, l: (0, 0)
        else:
            idx = lambda b, l: (0, 0, 0)
        if single_buffer:
            return pl.BlockSpec(shape, idx, pipeline_mode=pl.Buffered(1))
        return pl.BlockSpec(shape, idx)

    def _call(single_buffer_weights):
        grid_spec = pl.GridSpec(
            grid=(nb, nl),
            in_specs=[
                pl.BlockSpec((block_batch, Lblk, S), lambda b, l: (b, l, 0)),
                pl.BlockSpec((block_batch, Ddesc), lambda b, l: (b, 0)),
                _const_spec((Ddesc, D), single_buffer_weights),   # Wv
                _const_spec((1, D), single_buffer_weights),       # bv
                _const_spec((S, D), single_buffer_weights),       # Wo[:S]
                _const_spec((D, D), single_buffer_weights),       # Wo[S:]
                _const_spec((1, D), single_buffer_weights),       # bo
            ],
            out_specs=pl.BlockSpec((block_batch, Lblk, D), lambda b, l: (b, l, 0)),
        )
        return pl.pallas_call(
            _fusion_kernel,
            out_shape=jax.ShapeDtypeStruct((Bp, Lp, D), dtype),
            grid_spec=grid_spec,
            compiler_params=pltpu.CompilerParams(
                dimension_semantics=("parallel", "parallel"),
                vmem_limit_bytes=vmem_limit),
            cost_estimate=pl.CostEstimate(flops=flops, transcendentals=0,
                                          bytes_accessed=bytes_accessed),
        )(seq_features, desc_features, wv, bv2, wo_seq, wo_ctx, bo2)

    try:
        out = _call(True)        # single-buffer the constant weight blocks
    except Exception:            # fallback if Buffered(1) is unsupported
        out = _call(False)

    if Bp != B or Lp != L:
        out = out[:B, :L]        # copies only when padding actually occurred
    return out


def feature_fusion_reference(seq_features, desc_features, params, *, output_dim):
    """Pure-JAX reference mirroring the PyTorch FeatureFusion.forward exactly."""
    B, L, S = seq_features.shape
    desc_exp = jnp.broadcast_to(desc_features[:, None, :],
                                (B, L, desc_features.shape[1]))
    q = seq_features @ params["wq"] + params["bq"]
    k = desc_exp @ params["wk"] + params["bk"]
    v = desc_exp @ params["wv"] + params["bv"]
    scores = jnp.einsum("bqd,bkd->bqk", q, k) / math.sqrt(output_dim)
    attn = jax.nn.softmax(scores, axis=-1)
    context = jnp.einsum("bqk,bkd->bqd", attn, v)
    fused = jnp.concatenate([seq_features, context], axis=-1)
    return fused @ params["wo"] + params["bo"]


def init_params(key, seq_dim, desc_dim, output_dim):
    """Deterministic nn.Linear-style init (uniform(-1/sqrt(fan_in), +))."""
    def linear(k, fan_in, fan_out):
        kw, kb = jax.random.split(k)
        bound = 1.0 / math.sqrt(fan_in)
        w = jax.random.uniform(kw, (fan_in, fan_out), jnp.float32, -bound, bound)
        b = jax.random.uniform(kb, (fan_out,), jnp.float32, -bound, bound)
        return w, b

    k1, k2, k3, k4 = jax.random.split(key, 4)
    wq, bq = linear(k1, seq_dim, output_dim)
    wk, bk = linear(k2, desc_dim, output_dim)
    wv, bv = linear(k3, desc_dim, output_dim)
    wo, bo = linear(k4, seq_dim + output_dim, output_dim)
    return dict(wq=wq, bq=bq, wk=wk, bk=bk, wv=wv, bv=bv, wo=wo, bo=bo)


if __name__ == "__main__":
    # Small shapes consistent with RNAStructurePredictor's FeatureFusion
    # (embedding_dim=128 -> seq/desc dims, hidden_dim=256 -> output dim).
    B, L = 2, 8
    SEQ_DIM, DESC_DIM, OUTPUT_DIM = 128, 128, 256

    key = jax.random.PRNGKey(0)
    kp, ks, kd = jax.random.split(key, 3)

    params = init_params(kp, SEQ_DIM, DESC_DIM, OUTPUT_DIM)
    seq_features = jax.random.normal(ks, (B, L, SEQ_DIM), jnp.float32)
    desc_features = jax.random.normal(kd, (B, DESC_DIM), jnp.float32)

    out = feature_fusion(seq_features, desc_features, params,
                         output_dim=OUTPUT_DIM)
    out = jax.block_until_ready(out)

    ref = feature_fusion_reference(seq_features, desc_features, params,
                                   output_dim=OUTPUT_DIM)
    assert out.shape == (B, L, OUTPUT_DIM)
    assert jnp.allclose(out, ref, atol=1e-3, rtol=1e-3), "mismatch vs reference"

    print("KERNEL_OK")
</pallas_src>

<mosaic_0001>
module attributes {stable_mosaic.version = 11 : i64} {
  func.func @_fusion_kernel(%arg0: i32, %arg1: i32, %arg2: memref<8x8x128xf32, #tpu.memory_space<vmem>>, %arg3: memref<8x128xf32, #tpu.memory_space<vmem>>, %arg4: memref<128x256xf32, #tpu.memory_space<vmem>>, %arg5: memref<1x256xf32, #tpu.memory_space<vmem>>, %arg6: memref<128x256xf32, #tpu.memory_space<vmem>>, %arg7: memref<256x256xf32, #tpu.memory_space<vmem>>, %arg8: memref<1x256xf32, #tpu.memory_space<vmem>>, %arg9: memref<8x8x256xf32, #tpu.memory_space<vmem>>) attributes {dimension_semantics = [#tpu.dimension_semantics<parallel>, #tpu.dimension_semantics<parallel>], iteration_bounds = array<i64: 1, 1>, scalar_prefetch = 0 : i64, scratch_operands = 0 : i64, tpu.core_type = #tpu.core_type<tc>, window_params = [{transform_indices = @transform_0, window_bounds = array<i64: 8, 8, 128>}, {transform_indices = @transform_1, window_bounds = array<i64: 8, 128>}, {pipeline_mode = #tpu.pipeline_mode<synchronous>, transform_indices = @transform_2, window_bounds = array<i64: 128, 256>}, {pipeline_mode = #tpu.pipeline_mode<synchronous>, transform_indices = @transform_3, window_bounds = array<i64: 1, 256>}, {pipeline_mode = #tpu.pipeline_mode<synchronous>, transform_indices = @transform_4, window_bounds = array<i64: 128, 256>}, {pipeline_mode = #tpu.pipeline_mode<synchronous>, transform_indices = @transform_5, window_bounds = array<i64: 256, 256>}, {pipeline_mode = #tpu.pipeline_mode<synchronous>, transform_indices = @transform_6, window_bounds = array<i64: 1, 256>}, {transform_indices = @transform_7, window_bounds = array<i64: 8, 8, 256>}]} {
    %c0 = arith.constant 0 : index
    %c0_0 = arith.constant 0 : index
    %0 = vector.load %arg3[%c0, %c0_0] : memref<8x128xf32, #tpu.memory_space<vmem>>, vector<8x128xf32>
    %c0_1 = arith.constant 0 : index
    %c0_2 = arith.constant 0 : index
    %1 = vector.load %arg4[%c0_1, %c0_2] : memref<128x256xf32, #tpu.memory_space<vmem>>, vector<128x256xf32>
    %cst = arith.constant dense<0.000000e+00> : vector<8x256xf32>
    %2 = tpu.matmul %0, %1, %cst {dimension_numbers = #tpu.dot_dimension_numbers<[1], [0], [0], [1], [0, 0, 1, 1], [], []>} : vector<8x128xf32>, vector<128x256xf32>, vector<8x256xf32> -> vector<8x256xf32>
    %c0_3 = arith.constant 0 : index
    %c0_4 = arith.constant 0 : index
    %3 = vector.load %arg5[%c0_3, %c0_4] : memref<1x256xf32, #tpu.memory_space<vmem>>, vector<1x256xf32>
    %4 = vector.broadcast %3 : vector<1x256xf32> to vector<8x256xf32>
    %5 = arith.addf %2, %4 : vector<8x256xf32>
    %c0_5 = arith.constant 0 : index
    %c0_6 = arith.constant 0 : index
    %6 = vector.load %arg7[%c0_5, %c0_6] : memref<256x256xf32, #tpu.memory_space<vmem>>, vector<256x256xf32>
    %cst_7 = arith.constant dense<0.000000e+00> : vector<8x256xf32>
    %7 = tpu.matmul %5, %6, %cst_7 {dimension_numbers = #tpu.dot_dimension_numbers<[1], [0], [0], [1], [0, 0, 1, 1], [], []>} : vector<8x256xf32>, vector<256x256xf32>, vector<8x256xf32> -> vector<8x256xf32>
    %c0_8 = arith.constant 0 : index
    %c0_9 = arith.constant 0 : index
    %8 = vector.load %arg8[%c0_8, %c0_9] : memref<1x256xf32, #tpu.memory_space<vmem>>, vector<1x256xf32>
    %9 = vector.broadcast %8 : vector<1x256xf32> to vector<8x256xf32>
    %10 = arith.addf %7, %9 : vector<8x256xf32>
    %c0_10 = arith.constant 0 : index
    %c0_11 = arith.constant 0 : index
    %c0_12 = arith.constant 0 : index
    %11 = vector.load %arg2[%c0_10, %c0_11, %c0_12] : memref<8x8x128xf32, #tpu.memory_space<vmem>>, vector<8x8x128xf32>
    %12 = vector.shape_cast %11 : vector<8x8x128xf32> to vector<64x128xf32>
    %c0_13 = arith.constant 0 : index
    %c0_14 = arith.constant 0 : index
    %13 = vector.load %arg6[%c0_13, %c0_14] : memref<128x256xf32, #tpu.memory_space<vmem>>, vector<128x256xf32>
    %cst_15 = arith.constant dense<0.000000e+00> : vector<64x256xf32>
    %14 = tpu.matmul %12, %13, %cst_15 {dimension_numbers = #tpu.dot_dimension_numbers<[1], [0], [0], [1], [0, 0, 1, 1], [], []>} : vector<64x128xf32>, vector<128x256xf32>, vector<64x256xf32> -> vector<64x256xf32>
    %15 = vector.shape_cast %14 : vector<64x256xf32> to vector<8x8x256xf32>
    %16 = vector.shape_cast %10 : vector<8x256xf32> to vector<8x1x256xf32>
    %17 = vector.broadcast %16 : vector<8x1x256xf32> to vector<8x8x256xf32>
    %18 = arith.addf %15, %17 : vector<8x8x256xf32>
    %c0_16 = arith.constant 0 : index
    %c0_17 = arith.constant 0 : index
    %c0_18 = arith.constant 0 : index
    %19 = vector.load %arg9[%c0_16, %c0_17, %c0_18] : memref<8x8x256xf32, #tpu.memory_space<vmem>>, vector<8x8x256xf32>
    tpu.vector_store %arg9[%c0_16, %c0_17, %c0_18], %18 {strides = array<i32>} : memref<8x8x256xf32, #tpu.memory_space<vmem>>, vector<8x8x256xf32>,
    return
  }
  func.func @transform_0(%arg0: i32, %arg1: i32) -> (i32, i32, i32) {
    %c0_i32 = arith.constant 0 : i32
    %c0_i32_0 = arith.constant 0 : i32
    return %arg0, %arg1, %c0_i32 : i32, i32, i32
  }
  func.func @transform_1(%arg0: i32, %arg1: i32) -> (i32, i32) {
    %c0_i32 = arith.constant 0 : i32
    %c0_i32_0 = arith.constant 0 : i32
    return %arg0, %c0_i32 : i32, i32
  }
  func.func @transform_2(%arg0: i32, %arg1: i32) -> (i32, i32) {
    %c0_i32 = arith.constant 0 : i32
    %c0_i32_0 = arith.constant 0 : i32
    %c0_i32_1 = arith.constant 0 : i32
    return %c0_i32, %c0_i32_0 : i32, i32
  }
  func.func @transform_3(%arg0: i32, %arg1: i32) -> (i32, i32) {
    %c0_i32 = arith.constant 0 : i32
    %c0_i32_0 = arith.constant 0 : i32
    %c0_i32_1 = arith.constant 0 : i32
    return %c0_i32, %c0_i32_0 : i32, i32
  }
  func.func @transform_4(%arg0: i32, %arg1: i32) -> (i32, i32) {
    %c0_i32 = arith.constant 0 : i32
    %c0_i32_0 = arith.constant 0 : i32
    %c0_i32_1 = arith.constant 0 : i32
    return %c0_i32, %c0_i32_0 : i32, i32
  }
  func.func @transform_5(%arg0: i32, %arg1: i32) -> (i32, i32) {
    %c0_i32 = arith.constant 0 : i32
    %c0_i32_0 = arith.constant 0 : i32
    %c0_i32_1 = arith.constant 0 : i32
    return %c0_i32, %c0_i32_0 : i32, i32
  }
  func.func @transform_6(%arg0: i32, %arg1: i32) -> (i32, i32) {
    %c0_i32 = arith.constant 0 : i32
    %c0_i32_0 = arith.constant 0 : i32
    %c0_i32_1 = arith.constant 0 : i32
    return %c0_i32, %c0_i32_0 : i32, i32
  }
  func.func @transform_7(%arg0: i32, %arg1: i32) -> (i32, i32, i32) {
    %c0_i32 = arith.constant 0 : i32
    %c0_i32_0 = arith.constant 0 : i32
    return %arg0, %arg1, %c0_i32 : i32, i32, i32
  }
}

module attributes {stable_mosaic.version = 11 : i64} {
  func.func @_fusion_kernel(%arg0: i32, %arg1: i32, %arg2: memref<8x8x128xf32, #tpu.memory_space<vmem>>, %arg3: memref<8x128xf32, #tpu.memory_space<vmem>>, %arg4: memref<128x256xf32, #tpu.memory_space<vmem>>, %arg5: memref<1x256xf32, #tpu.memory_space<vmem>>, %arg6: memref<128x256xf32, #tpu.memory_space<vmem>>, %arg7: memref<256x256xf32, #tpu.memory_space<vmem>>, %arg8: memref<1x256xf32, #tpu.memory_space<vmem>>, %arg9: memref<8x8x256xf32, #tpu.memory_space<vmem>>) attributes {dimension_semantics = [#tpu.dimension_semantics<parallel>, #tpu.dimension_semantics<parallel>], iteration_bounds = array<i64: 1, 1>, scalar_prefetch = 0 : i64, scratch_operands = 0 : i64, tpu.core_type = #tpu.core_type<tc>, window_params = [{transform_indices = @transform_0, window_bounds = array<i64: 8, 8, 128>}, {transform_indices = @transform_1, window_bounds = array<i64: 8, 128>}, {pipeline_mode = #tpu.pipeline_mode<synchronous>, transform_indices = @transform_2, window_bounds = array<i64: 128, 256>}, {pipeline_mode = #tpu.pipeline_mode<synchronous>, transform_indices = @transform_3, window_bounds = array<i64: 1, 256>}, {pipeline_mode = #tpu.pipeline_mode<synchronous>, transform_indices = @transform_4, window_bounds = array<i64: 128, 256>}, {pipeline_mode = #tpu.pipeline_mode<synchronous>, transform_indices = @transform_5, window_bounds = array<i64: 256, 256>}, {pipeline_mode = #tpu.pipeline_mode<synchronous>, transform_indices = @transform_6, window_bounds = array<i64: 1, 256>}, {transform_indices = @transform_7, window_bounds = array<i64: 8, 8, 256>}]} {
    %c0 = arith.constant 0 : index
    %c0_0 = arith.constant 0 : index
    %0 = vector.load %arg3[%c0, %c0_0] : memref<8x128xf32, #tpu.memory_space<vmem>>, vector<8x128xf32>
    %c0_1 = arith.constant 0 : index
    %c0_2 = arith.constant 0 : index
    %1 = vector.load %arg4[%c0_1, %c0_2] : memref<128x256xf32, #tpu.memory_space<vmem>>, vector<128x256xf32>
    %cst = arith.constant dense<0.000000e+00> : vector<8x256xf32>
    %2 = tpu.matmul %0, %1, %cst {dimension_numbers = #tpu.dot_dimension_numbers<[1], [0], [0], [1], [0, 0, 1, 1], [], []>} : vector<8x128xf32>, vector<128x256xf32>, vector<8x256xf32> -> vector<8x256xf32>
    %c0_3 = arith.constant 0 : index
    %c0_4 = arith.constant 0 : index
    %3 = vector.load %arg5[%c0_3, %c0_4] : memref<1x256xf32, #tpu.memory_space<vmem>>, vector<1x256xf32>
    %4 = vector.broadcast %3 : vector<1x256xf32> to vector<8x256xf32>
    %5 = arith.addf %2, %4 : vector<8x256xf32>
    %c0_5 = arith.constant 0 : index
    %c0_6 = arith.constant 0 : index
    %6 = vector.load %arg7[%c0_5, %c0_6] : memref<256x256xf32, #tpu.memory_space<vmem>>, vector<256x256xf32>
    %cst_7 = arith.constant dense<0.000000e+00> : vector<8x256xf32>
    %7 = tpu.matmul %5, %6, %cst_7 {dimension_numbers = #tpu.dot_dimension_numbers<[1], [0], [0], [1], [0, 0, 1, 1], [], []>} : vector<8x256xf32>, vector<256x256xf32>, vector<8x256xf32> -> vector<8x256xf32>
    %c0_8 = arith.constant 0 : index
    %c0_9 = arith.constant 0 : index
    %8 = vector.load %arg8[%c0_8, %c0_9] : memref<1x256xf32, #tpu.memory_space<vmem>>, vector<1x256xf32>
    %9 = vector.broadcast %8 : vector<1x256xf32> to vector<8x256xf32>
    %10 = arith.addf %7, %9 : vector<8x256xf32>
    %c0_10 = arith.constant 0 : index
    %c0_11 = arith.constant 0 : index
    %c0_12 = arith.constant 0 : index
    %11 = vector.load %arg2[%c0_10, %c0_11, %c0_12] : memref<8x8x128xf32, #tpu.memory_space<vmem>>, vector<8x8x128xf32>
    %12 = vector.shape_cast %11 : vector<8x8x128xf32> to vector<64x128xf32>
    %c0_13 = arith.constant 0 : index
    %c0_14 = arith.constant 0 : index
    %13 = vector.load %arg6[%c0_13, %c0_14] : memref<128x256xf32, #tpu.memory_space<vmem>>, vector<128x256xf32>
    %cst_15 = arith.constant dense<0.000000e+00> : vector<64x256xf32>
    %14 = tpu.matmul %12, %13, %cst_15 {dimension_numbers = #tpu.dot_dimension_numbers<[1], [0], [0], [1], [0, 0, 1, 1], [], []>} : vector<64x128xf32>, vector<128x256xf32>, vector<64x256xf32> -> vector<64x256xf32>
    %15 = vector.shape_cast %14 : vector<64x256xf32> to vector<8x8x256xf32>
    %16 = vector.shape_cast %10 : vector<8x256xf32> to vector<8x1x256xf32>
    %17 = vector.broadcast %16 : vector<8x1x256xf32> to vector<8x8x256xf32>
    %18 = arith.addf %15, %17 : vector<8x8x256xf32>
    %c0_16 = arith.constant 0 : index
    %c0_17 = arith.constant 0 : index
    %c0_18 = arith.constant 0 : index
    %19 = vector.load %arg9[%c0_16, %c0_17, %c0_18] : memref<8x8x256xf32, #tpu.memory_space<vmem>>, vector<8x8x256xf32>
    tpu.vector_store %arg9[%c0_16, %c0_17, %c0_18], %18 {strides = array<i32>} : memref<8x8x256xf32, #tpu.memory_space<vmem>>, vector<8x8x256xf32>,
    return
  }
  func.func @transform_0(%arg0: i32, %arg1: i32) -> (i32, i32, i32) {
    %c0_i32 = arith.constant 0 : i32
    %c0_i32_0 = arith.constant 0 : i32
    return %arg0, %arg1, %c0_i32 : i32, i32, i32
  }
  func.func @transform_1(%arg0: i32, %arg1: i32) -> (i32, i32) {
    %c0_i32 = arith.constant 0 : i32
    %c0_i32_0 = arith.constant 0 : i32
    return %arg0, %c0_i32 : i32, i32
  }
  func.func @transform_2(%arg0: i32, %arg1: i32) -> (i32, i32) {
    %c0_i32 = arith.constant 0 : i32
    %c0_i32_0 = arith.constant 0 : i32
    %c0_i32_1 = arith.constant 0 : i32
    return %c0_i32, %c0_i32_0 : i32, i32
  }
  func.func @transform_3(%arg0: i32, %arg1: i32) -> (i32, i32) {
    %c0_i32 = arith.constant 0 : i32
    %c0_i32_0 = arith.constant 0 : i32
    %c0_i32_1 = arith.constant 0 : i32
    return %c0_i32, %c0_i32_0 : i32, i32
  }
  func.func @transform_4(%arg0: i32, %arg1: i32) -> (i32, i32) {
    %c0_i32 = arith.constant 0 : i32
    %c0_i32_0 = arith.constant 0 : i32
    %c0_i32_1 = arith.constant 0 : i32
    return %c0_i32, %c0_i32_0 : i32, i32
  }
  func.func @transform_5(%arg0: i32, %arg1: i32) -> (i32, i32) {
    %c0_i32 = arith.constant 0 : i32
    %c0_i32_0 = arith.constant 0 : i32
    %c0_i32_1 = arith.constant 0 : i32
    return %c0_i32, %c0_i32_0 : i32, i32
  }
  func.func @transform_6(%arg0: i32, %arg1: i32) -> (i32, i32) {
    %c0_i32 = arith.constant 0 : i32
    %c0_i32_0 = arith.constant 0 : i32
    %c0_i32_1 = arith.constant 0 : i32
    return %c0_i32, %c0_i32_0 : i32, i32
  }
  func.func @transform_7(%arg0: i32, %arg1: i32) -> (i32, i32, i32) {
    %c0_i32 = arith.constant 0 : i32
    %c0_i32_0 = arith.constant 0 : i32
    return %arg0, %arg1, %c0_i32 : i32, i32, i32
  }
}

</mosaic_0001>

<bundles_post_ra>
// kernel: tpu_custom_call.1
= control target key start
LH: loop header
LB: loop body
LE: loop exit
PB: predicated region body
PF: predicated region fallthrough
CT: control target
= control target key end

     0   :  { %12 = vsyncpa [#allocation3], 0  ;;  %s827_s0 = inlined_call_operand.hbm [shape: f32[8,8,128], index: 0, kind: input, shape index: {}]   ;;  %s828_s1 = inlined_call_operand.hbm [shape: f32[8,128], index: 1, kind: input, shape index: {}]   ;;  %s829_s2 = inlined_call_operand.hbm [shape: f32[128,256], index: 2, kind: input, shape index: {}]   ;;  %s830_s3 = inlined_call_operand.vmem [shape: f32[1,256], index: 3, kind: input, shape index: {}]   ;;  %s831_s4 = inlined_call_operand.hbm [shape: f32[128,256], index: 4, kind: input, shape index: {}]   ;;  %s832_s5 = inlined_call_operand.hbm [shape: f32[256,256], index: 5, kind: input, shape index: {}]   ;;  %s833_s6 = inlined_call_operand.vmem [shape: f32[1,256], index: 6, kind: input, shape index: {}]   ;;  %s834_s7 = inlined_call_operand.hbm [shape: f32[8,8,256], index: 7, kind: output, shape index: {}]  }
   0x1   :  { %13 = vsyncpa [#allocation6], 0 }
   0x2   :  { %14 = vsyncpa [#allocation9], 0  ;;  %s34_s26 = sshll.u32 %s828_s1, 4  ;;  %s35_s26 = int_to_ptr.hbm [resolvable:$true] %s34_s26 }
   0x3   :  { %15 = vsyncpa [#allocation4], 0  ;;  %s727_s27 = smov [#allocation5]   ;;  %s59_s8 = sshll.u32 %s831_s4, 4  ;;  %s60_s8 = int_to_ptr.hbm [resolvable:$true] %s59_s8 }
   0x4   :  { %s36_s28 = sshll.u32 %s727_s27, 4  ;;  %s728_s9 = smov [#allocation8]   ;;  %s37_s28 = int_to_ptr.vmem [resolvable:$true] %s36_s28 }
   0x5   :  { %39 = dma.hbm_to_vmem [thread:$0]  %s35_s26, 128, %s37_s28, [#allocation6]  }
   0x6   :  { %s61_s10 = sshll.u32 %s728_s9, 4  ;;  %s20_s13 = sshll.u32 %s827_s0, 4  ;;  %s62_s10 = int_to_ptr.vmem [resolvable:$true] %s61_s10  ;;  %s21_s13 = int_to_ptr.hbm [resolvable:$true] %s20_s13 }
   0x7   :  { %s729_s1 = smov 256   ;;  %s730_s14 = smov 16  }
   0x8   :  { %67 = dma.hbm_to_vmem [thread:$0]  %s60_s8, 4096, %s62_s10, [#allocation9], %s729_s1, %s729_s1, %s730_s14  }
   0x9   :  { %s731_s15 = smov [#allocation2]   ;;  %s44_s18 = sshll.u32 %s829_s2, 4  ;;  %s45_s18 = int_to_ptr.hbm [resolvable:$true] %s44_s18 }
   0xa   :  { %s22_s16 = sshll.u32 %s731_s15, 4  ;;  %s732_s19 = smov 128   ;;  %s23_s16 = int_to_ptr.vmem [resolvable:$true] %s22_s16 }
   0xb   :  { %s733_s20 = smov 8   ;;  %s734_s0 = smov [#allocation7]  }
   0xc   :  { %28 = dma.hbm_to_vmem [thread:$0]  %s21_s13, 1024, %s23_s16, [#allocation3], %s732_s19, %s732_s19, %s733_s20  }
   0xd   :  { %s46_s21 = sshll.u32 %s734_s0, 4  ;;  %s72_s24 = sshll.u32 %s832_s5, 4  ;;  %s47_s21 = int_to_ptr.vmem [resolvable:$true] %s46_s21  ;;  %s73_s24 = int_to_ptr.hbm [resolvable:$true] %s72_s24 }
   0xe   :  { %52 = dma.hbm_to_vmem [thread:$0]  %s45_s18, 4096, %s47_s21, [#allocation6], %s729_s1, %s729_s1, %s730_s14  }
   0xf   :  { %s735_s25 = smov [#allocation10]  }
  0x10   :  { %s74_s26 = sshll.u32 %s735_s25, 4  ;;  %s75_s26 = int_to_ptr.vmem [resolvable:$true] %s74_s26 }
  0x11   :  { %80 = dma.hbm_to_vmem [thread:$0]  %s73_s24, 8192, %s75_s26, [#allocation9], %s729_s1, %s729_s1, %s730_s14  }
  0x12   :  { %719 = dma.done.wait [#allocation3], 1024  }
  0x13   :  { %720 = vsyncadd [#allocation3], 4294966272 }
  0x14   :  { %721 = dma.done.wait [#allocation6], 4224  }
  0x15   :  { %722 = vsyncadd [#allocation6], 4294963072 }
  0x16   :  { %723 = dma.done.wait [#allocation9], 12288  }
  0x17   :  { %724 = vsyncadd [#allocation9], 4294955008  ;;  %v134_v0 = vld [vmem:[#allocation7 + $0xf0] sm:$0xff]  ;;  %v135_v1 = vld [vmem:[#allocation7 + $0xf8] sm:$0xff]  ;;  %vm457_vm0 = vcmask 1040384   ;;  %vm459_vm1 = vcmask 1041409  }
  0x18   :  { %v132_v2 = vld [vmem:[#allocation7 + $0xe0] sm:$0xff]  ;;  %142 = vmatpush.msra.mxu0 %v134_v0  ;;  %162 = vmatpush.msra.mxu1 %v135_v1  ;;  %v133_v3 = vld [vmem:[#allocation7 + $0xe8] sm:$0xff]  ;;  %v130_v4 = vld [vmem:[#allocation7 + $0xd0] sm:$0xff]  ;;  %vm462_vm2 = vcmask 1042434   ;;  %vm465_vm3 = vcmask 1043459   ;;  %vm468_vm4 = vcmask 1044484  }
  0x19   :  { %v131_v5 = vld [vmem:[#allocation7 + $0xd8] sm:$0xff]  ;;  %v128_v6 = vld [vmem:[#allocation7 + $0xc0] sm:$0xff]  ;;  %v129_v7 = vld [vmem:[#allocation7 + $0xc8] sm:$0xff]  ;;  %vm471_vm5 = vcmask 1045509   ;;  %vm474_vm6 = vcmask 1046534   ;;  %vm477_vm7 = vcmask 1046528  }
  0x1a   :  { %143 = vmatpush.msra.mxu0 %v132_v2  ;;  %163 = vmatpush.msra.mxu1 %v133_v3  ;;  %v126_v8 = vld [vmem:[#allocation7 + $0xb0] sm:$0xff]  ;;  %v127_v9 = vld [vmem:[#allocation7 + $0xb8] sm:$0xff]  ;;  %v124_v10 = vld [vmem:[#allocation7 + $0xa0] sm:$0xff]  ;;  %s550_s8 = sshll.u32 %s834_s7, 4  ;;  %s551_s8 = int_to_ptr.hbm [resolvable:$true] %s550_s8 }
  0x1b   :  { %v125_v11 = vld [vmem:[#allocation7 + $0xa8] sm:$0xff]  ;;  %v122_v12 = vld [vmem:[#allocation7 + $0x90] sm:$0xff]  ;;  %v123_v13 = vld [vmem:[#allocation7 + $0x98] sm:$0xff] }
  0x1c   :  { %144 = vmatpush.msra.mxu0 %v130_v4  ;;  %164 = vmatpush.msra.mxu1 %v131_v5  ;;  %v370_v14 = vld [vmem:[#allocation8 + $0xf0] sm:$0xff]  ;;  %v371_v15 = vld [vmem:[#allocation8 + $0xf8] sm:$0xff]  ;;  %v368_v16 = vld [vmem:[#allocation8 + $0xe0] sm:$0xff] }
  0x1d   :  { %v120_v17 = vld [vmem:[#allocation7 + $0x80] sm:$0xff]  ;;  %v121_v18 = vld [vmem:[#allocation7 + $0x88] sm:$0xff]  ;;  %372 = vmatpush.msra.mxu2 %v370_v14  ;;  %413 = vmatpush.msra.mxu3 %v371_v15  ;;  %v366_v20 = vld [vmem:[#allocation8 + $0xd0] sm:$0xff] }
  0x1e   :  { %145 = vmatpush.msra.mxu0 %v128_v6  ;;  %165 = vmatpush.msra.mxu1 %v129_v7  ;;  %v369_v19 = vld [vmem:[#allocation8 + $0xe8] sm:$0xff]  ;;  %v367_v21 = vld [vmem:[#allocation8 + $0xd8] sm:$0xff]  ;;  %v118_v22 = vld [vmem:[#allocation7 + $0x70] sm:$0xff] }
  0x1f   :  { %v119_v23 = vld [vmem:[#allocation7 + $0x78] sm:$0xff]  ;;  %373 = vmatpush.msra.mxu2 %v368_v16  ;;  %414 = vmatpush.msra.mxu3 %v369_v19  ;;  %v364_v24 = vld [vmem:[#allocation8 + $0xc0] sm:$0xff]  ;;  %v365_v25 = vld [vmem:[#allocation8 + $0xc8] sm:$0xff] }
  0x20   :  { %146 = vmatpush.msra.mxu0 %v126_v8  ;;  %166 = vmatpush.msra.mxu1 %v127_v9  ;;  %v116_v26 = vld [vmem:[#allocation7 + $0x60] sm:$0xff]  ;;  %v117_v27 = vld [vmem:[#allocation7 + $0x68] sm:$0xff]  ;;  %v362_v28 = vld [vmem:[#allocation8 + $0xb0] sm:$0xff] }
  0x21   :  { %374 = vmatpush.msra.mxu2 %v366_v20  ;;  %415 = vmatpush.msra.mxu3 %v367_v21  ;;  %v363_v29 = vld [vmem:[#allocation8 + $0xb8] sm:$0xff]  ;;  %v114_v30 = vld [vmem:[#allocation7 + $0x50] sm:$0xff]  ;;  %v360_v32 = vld [vmem:[#allocation8 + $0xa0] sm:$0xff] }
  0x22   :  { %147 = vmatpush.msra.mxu0 %v124_v10  ;;  %167 = vmatpush.msra.mxu1 %v125_v11  ;;  %v115_v31 = vld [vmem:[#allocation7 + $0x58] sm:$0xff]  ;;  %v361_v33 = vld [vmem:[#allocation8 + $0xa8] sm:$0xff]  ;;  %v112_v34 = vld [vmem:[#allocation7 + $0x40] sm:$0xff] }
  0x23   :  { %375 = vmatpush.msra.mxu2 %v364_v24  ;;  %416 = vmatpush.msra.mxu3 %v365_v25  ;;  %v113_v35 = vld [vmem:[#allocation7 + $0x48] sm:$0xff]  ;;  %v358_v36 = vld [vmem:[#allocation8 + $0x90] sm:$0xff]  ;;  %v359_v37 = vld [vmem:[#allocation8 + $0x98] sm:$0xff] }
  0x24   :  { %148 = vmatpush.msra.mxu0 %v122_v12  ;;  %168 = vmatpush.msra.mxu1 %v123_v13  ;;  %v110_v38 = vld [vmem:[#allocation7 + $0x30] sm:$0xff]  ;;  %v111_v39 = vld [vmem:[#allocation7 + $0x38] sm:$0xff]  ;;  %v356_v40 = vld [vmem:[#allocation8 + $0x80] sm:$0xff] }
  0x25   :  { %376 = vmatpush.msra.mxu2 %v362_v28  ;;  %417 = vmatpush.msra.mxu3 %v363_v29  ;;  %v357_v41 = vld [vmem:[#allocation8 + $0x88] sm:$0xff]  ;;  %v108_v42 = vld [vmem:[#allocation7 + $0x20] sm:$0xff]  ;;  %v354_v44 = vld [vmem:[#allocation8 + $0x70] sm:$0xff] }
  0x26   :  { %149 = vmatpush.msra.mxu0 %v120_v17  ;;  %169 = vmatpush.msra.mxu1 %v121_v18  ;;  %v109_v43 = vld [vmem:[#allocation7 + $0x28] sm:$0xff]  ;;  %v355_v45 = vld [vmem:[#allocation8 + $0x78] sm:$0xff]  ;;  %v106_v46 = vld [vmem:[#allocation7 + $0x10] sm:$0xff] }
  0x27   :  { %377 = vmatpush.msra.mxu2 %v360_v32  ;;  %418 = vmatpush.msra.mxu3 %v361_v33  ;;  %v107_v47 = vld [vmem:[#allocation7 + $0x18] sm:$0xff]  ;;  %v352_v48 = vld [vmem:[#allocation8 + $0x60] sm:$0xff]  ;;  %v353_v49 = vld [vmem:[#allocation8 + $0x68] sm:$0xff] }
  0x28   :  { %150 = vmatpush.msra.mxu0 %v118_v22  ;;  %170 = vmatpush.msra.mxu1 %v119_v23  ;;  %v104_v50 = vld [vmem:[#allocation7] sm:$0xff]  ;;  %v105_v51 = vld [vmem:[#allocation7 + $0x8] sm:$0xff]  ;;  %v103_v52 = vld [vmem:[#allocation5] sm:$0xff] }
  0x29   :  { %378 = vmatpush.msra.mxu2 %v358_v36  ;;  %419 = vmatpush.msra.mxu3 %v359_v37  ;;  %v212_v53 = vld [vmem:[#allocation10 + $0xf0] sm:$0xff]  ;;  %v351_v56 = vld [vmem:[#allocation8 + $0x58] sm:$0xff]  ;;  %v210_v57 = vld [vmem:[#allocation10 + $0xe0] sm:$0xff] }
  0x2a   :  { %151 = vmatpush.msra.mxu0 %v116_v26  ;;  %171 = vmatpush.msra.mxu1 %v117_v27  ;;  %v244_v54 = vld [vmem:[#allocation10 + $0x1f0] sm:$0xff]  ;;  %v242_v58 = vld [vmem:[#allocation10 + $0x1e0] sm:$0xff]  ;;  %v349_v60 = vld [vmem:[#allocation8 + $0x48] sm:$0xff] }
  0x2b   :  { %379 = vmatpush.msra.mxu2 %v356_v40  ;;  %420 = vmatpush.msra.mxu3 %v357_v41  ;;  %v350_v55 = vld [vmem:[#allocation8 + $0x50] sm:$0xff]  ;;  %v348_v59 = vld [vmem:[#allocation8 + $0x40] sm:$0xff]  ;;  %v347_v0 = vld [vmem:[#allocation8 + $0x38] sm:$0xff] }
  0x2c   :  { %152 = vmatpush.msra.mxu0 %v114_v30  ;;  %172 = vmatpush.msra.mxu1 %v115_v31  ;;  %v208_v61 = vld [vmem:[#allocation10 + $0xd0] sm:$0xff]  ;;  %v206_v1 = vld [vmem:[#allocation10 + $0xc0] sm:$0xff]  ;;  %v345_v4 = vld [vmem:[#allocation8 + $0x28] sm:$0xff] }
  0x2d   :  { %380 = vmatpush.msra.mxu2 %v354_v44  ;;  %421 = vmatpush.msra.mxu3 %v355_v45  ;;  %v240_v62 = vld [vmem:[#allocation10 + $0x1d0] sm:$0xff]  ;;  %v238_v2 = vld [vmem:[#allocation10 + $0x1c0] sm:$0xff]  ;;  %v343_v8 = vld [vmem:[#allocation8 + $0x18] sm:$0xff] }
  0x2e   :  { %153 = vmatpush.msra.mxu0 %v112_v34  ;;  %173 = vmatpush.msra.mxu1 %v113_v35  ;;  %v346_v63 = vld [vmem:[#allocation8 + $0x30] sm:$0xff]  ;;  %v344_v3 = vld [vmem:[#allocation8 + $0x20] sm:$0xff]  ;;  %v341_v12 = vld [vmem:[#allocation8 + $0x8] sm:$0xff] }
  0x2f   :  { %381 = vmatpush.msra.mxu2 %v352_v48  ;;  %422 = vmatpush.msra.mxu3 %v353_v49  ;;  %v204_v5 = vld [vmem:[#allocation10 + $0xb0] sm:$0xff]  ;;  %v202_v9 = vld [vmem:[#allocation10 + $0xa0] sm:$0xff]  ;;  %v332_v13 = vld [vmem:[#allocation2] sm:$0xff] }
  0x30   :  { %154 = vmatpush.msra.mxu0 %v110_v38  ;;  %174 = vmatpush.msra.mxu1 %v111_v39  ;;  %v236_v6 = vld [vmem:[#allocation10 + $0x1b0] sm:$0xff]  ;;  %v234_v10 = vld [vmem:[#allocation10 + $0x1a0] sm:$0xff]  ;;  %v334_v31 = vld [vmem:[#allocation2 + $0x10] sm:$0xff] }
  0x31   :  { %382 = vmatpush.msra.mxu2 %v350_v55  ;;  %423 = vmatpush.msra.mxu3 %v351_v56  ;;  %v342_v7 = vld [vmem:[#allocation8 + $0x10] sm:$0xff]  ;;  %v340_v11 = vld [vmem:[#allocation8] sm:$0xff]  ;;  %v213_v36 = vld [vmem:[#allocation10 + $0xf8] sm:$0xff] }
  0x32   :  { %155 = vmatpush.msra.mxu0 %v108_v42  ;;  %175 = vmatpush.msra.mxu1 %v109_v43  ;;  %v200_v14 = vld [vmem:[#allocation10 + $0x90] sm:$0xff]  ;;  %v198_v16 = vld [vmem:[#allocation10 + $0x80] sm:$0xff]  ;;  %v245_v37 = vld [vmem:[#allocation10 + $0x1f8] sm:$0xff] }
  0x33   :  { %383 = vmatpush.msra.mxu2 %v348_v59  ;;  %424 = vmatpush.msra.mxu3 %v349_v60  ;;  %v232_v15 = vld [vmem:[#allocation10 + $0x190] sm:$0xff]  ;;  %v230_v17 = vld [vmem:[#allocation10 + $0x180] sm:$0xff]  ;;  %v211_v38 = vld [vmem:[#allocation10 + $0xe8] sm:$0xff] }
  0x34   :  { %156 = vmatpush.msra.mxu0 %v106_v46  ;;  %176 = vmatpush.msra.mxu1 %v107_v47  ;;  %v196_v18 = vld [vmem:[#allocation10 + $0x70] sm:$0xff]  ;;  %v194_v20 = vld [vmem:[#allocation10 + $0x60] sm:$0xff]  ;;  %v243_v39 = vld [vmem:[#allocation10 + $0x1e8] sm:$0xff] }
  0x35   :  { %384 = vmatpush.msra.mxu2 %v346_v63  ;;  %425 = vmatpush.msra.mxu3 %v347_v0  ;;  %v228_v19 = vld [vmem:[#allocation10 + $0x170] sm:$0xff]  ;;  %v226_v21 = vld [vmem:[#allocation10 + $0x160] sm:$0xff]  ;;  %v209_v40 = vld [vmem:[#allocation10 + $0xd8] sm:$0xff] }
  0x36   :  { %157 = vmatpush.msra.mxu0 %v104_v50  ;;  %177 = vmatpush.msra.mxu1 %v105_v51  ;;  %v333_v22 = vld [vmem:[#allocation2 + $0x8] sm:$0xff]  ;;  %v192_v23 = vld [vmem:[#allocation10 + $0x50] sm:$0xff]  ;;  %v241_v41 = vld [vmem:[#allocation10 + $0x1d8] sm:$0xff] }
  0x37   :  { %158 = vmatmul.f32.vlgmr.msra.gmra.mxu0 %v103_v52  ;;  %178 = vmatmul.f32.vlgmr.msra.gmra.mxu1 %v103_v52  ;;  %v224_v24 = vld [vmem:[#allocation10 + $0x150] sm:$0xff]  ;;  %v190_v25 = vld [vmem:[#allocation10 + $0x40] sm:$0xff]  ;;  %v207_v43 = vld [vmem:[#allocation10 + $0xc8] sm:$0xff] }
  0x38   :  { %252 = vmatpush.msrb.mxu0 %v212_v53  ;;  %272 = vmatpush.msrb.mxu1 %v244_v54  ;;  %v222_v26 = vld [vmem:[#allocation10 + $0x140] sm:$0xff]  ;;  %v188_v27 = vld [vmem:[#allocation10 + $0x30] sm:$0xff]  ;;  %v239_v44 = vld [vmem:[#allocation10 + $0x1c8] sm:$0xff] }
  0x39   :  { %385 = vmatpush.msra.mxu2 %v344_v3  ;;  %426 = vmatpush.msra.mxu3 %v345_v4  ;;  %v220_v28 = vld [vmem:[#allocation10 + $0x130] sm:$0xff]  ;;  %v186_v29 = vld [vmem:[#allocation10 + $0x20] sm:$0xff]  ;;  %v205_v45 = vld [vmem:[#allocation10 + $0xb8] sm:$0xff] }
  0x3a   :  { %253 = vmatpush.msrb.mxu0 %v210_v57  ;;  %273 = vmatpush.msrb.mxu1 %v242_v58  ;;  %v218_v30 = vld [vmem:[#allocation10 + $0x120] sm:$0xff]  ;;  %v184_v32 = vld [vmem:[#allocation10 + $0x10] sm:$0xff]  ;;  %v237_v46 = vld [vmem:[#allocation10 + $0x1b8] sm:$0xff] }
  0x3b   :  { %386 = vmatpush.msra.mxu2 %v342_v7  ;;  %427 = vmatpush.msra.mxu3 %v343_v8  ;;  %v216_v33 = vld [vmem:[#allocation10 + $0x110] sm:$0xff]  ;;  %v182_v34 = vld [vmem:[#allocation10] sm:$0xff]  ;;  %v203_v47 = vld [vmem:[#allocation10 + $0xa8] sm:$0xff] }
  0x3c   :  { %254 = vmatpush.msrb.mxu0 %v208_v61  ;;  %274 = vmatpush.msrb.mxu1 %v240_v62  ;;  %v214_v35 = vld [vmem:[#allocation10 + $0x100] sm:$0xff]  ;;  %v335_v42 = vld [vmem:[#allocation2 + $0x18] sm:$0xff]  ;;  %v235_v48 = vld [vmem:[#allocation10 + $0x1a8] sm:$0xff] }
  0x3d   :  { %387 = vmatpush.msra.mxu2 %v340_v11  ;;  %428 = vmatpush.msra.mxu3 %v341_v12  ;;  %v201_v49 = vld [vmem:[#allocation10 + $0x98] sm:$0xff]  ;;  %v199_v52 = vld [vmem:[#allocation10 + $0x88] sm:$0xff]  ;;  %v337_v60 = vld [vmem:[#allocation2 + $0x28] sm:$0xff] }
  0x3e   :  { %255 = vmatpush.msrb.mxu0 %v206_v1  ;;  %275 = vmatpush.msrb.mxu1 %v238_v2  ;;  %v233_v50 = vld [vmem:[#allocation10 + $0x198] sm:$0xff]  ;;  %v231_v53 = vld [vmem:[#allocation10 + $0x188] sm:$0xff]  ;;  %v339_v8 = vld [vmem:[#allocation2 + $0x38] sm:$0xff] }
  0x3f   :  { %388 = vmatmul.f32.vlgmr.msra.gmra.mxu2 %v332_v13  ;;  %429 = vmatmul.f32.vlgmr.msra.gmra.mxu3 %v332_v13  ;;  %v336_v51 = vld [vmem:[#allocation2 + $0x20] sm:$0xff]  ;;  %v195_v56 = vld [vmem:[#allocation10 + $0x68] sm:$0xff] }
  0x40   :  { %256 = vmatpush.msrb.mxu0 %v204_v5  ;;  %276 = vmatpush.msrb.mxu1 %v236_v6  ;;  %v197_v54 = vld [vmem:[#allocation10 + $0x78] sm:$0xff]  ;;  %v227_v57 = vld [vmem:[#allocation10 + $0x168] sm:$0xff] }
  0x41   :  { %v229_v55 = vld [vmem:[#allocation10 + $0x178] sm:$0xff]  ;;  %v191_v61 = vld [vmem:[#allocation10 + $0x48] sm:$0xff] }
  0x42   :  { %257 = vmatpush.msrb.mxu0 %v202_v9  ;;  %277 = vmatpush.msrb.mxu1 %v234_v10  ;;  %v193_v58 = vld [vmem:[#allocation10 + $0x58] sm:$0xff]  ;;  %v223_v62 = vld [vmem:[#allocation10 + $0x148] sm:$0xff] }
  0x43   :  { %v225_v59 = vld [vmem:[#allocation10 + $0x158] sm:$0xff]  ;;  %v187_v1 = vld [vmem:[#allocation10 + $0x28] sm:$0xff] }
  0x44   :  { %258 = vmatpush.msrb.mxu0 %v200_v14  ;;  %278 = vmatpush.msrb.mxu1 %v232_v15  ;;  %v189_v63 = vld [vmem:[#allocation10 + $0x38] sm:$0xff]  ;;  %v219_v2 = vld [vmem:[#allocation10 + $0x128] sm:$0xff] }
  0x45   :  { %v221_v0 = vld [vmem:[#allocation10 + $0x138] sm:$0xff]  ;;  %v338_v5 = vld [vmem:[#allocation2 + $0x30] sm:$0xff] }
  0x46   :  { %259 = vmatpush.msrb.mxu0 %v198_v16  ;;  %279 = vmatpush.msrb.mxu1 %v230_v17  ;;  %v185_v3 = vld [vmem:[#allocation10 + $0x18] sm:$0xff]  ;;  %v183_v6 = vld [vmem:[#allocation10 + $0x8] sm:$0xff] }
  0x47   :  { %391 = vmatmul.f32.gmra.mxu2 %v333_v22  ;;  %432 = vmatmul.f32.gmra.mxu3 %v333_v22  ;;  %v217_v4 = vld [vmem:[#allocation10 + $0x118] sm:$0xff]  ;;  %v215_v7 = vld [vmem:[#allocation10 + $0x108] sm:$0xff] }
  0x48   :  { %260 = vmatpush.msrb.mxu0 %v196_v18  ;;  %280 = vmatpush.msrb.mxu1 %v228_v19  ;;  %v136_v9 = vld [vmem:[%s830_s3] sm:$0x3] }
  0x49   :  { %v138_v10 = vperm.slane %v136_v9, 0  ;;  %v139_v11 = vperm.slane %v136_v9, 1 }
  0x4a   :  { %261 = vmatpush.msrb.mxu0 %v194_v20  ;;  %281 = vmatpush.msrb.mxu1 %v226_v21 }
  0x4c   :  { %262 = vmatpush.msrb.mxu0 %v192_v23  ;;  %282 = vmatpush.msrb.mxu1 %v224_v24 }
  0x4e   :  { %263 = vmatpush.msrb.mxu0 %v190_v25  ;;  %283 = vmatpush.msrb.mxu1 %v222_v26 }
  0x4f   :  { %394 = vmatmul.f32.gmra.mxu2 %v334_v31  ;;  %435 = vmatmul.f32.gmra.mxu3 %v334_v31 }
  0x50   :  { %264 = vmatpush.msrb.mxu0 %v188_v27  ;;  %284 = vmatpush.msrb.mxu1 %v220_v28  ;;  %v246_v28 = vld [vmem:[%s833_s6] sm:$0x3]  ;;  %s736_s6 = smov [#allocation11]  }
  0x51   :  { %s548_s28 = sshll.u32 %s736_s6, 4  ;;  %s549_s28 = int_to_ptr.vmem [resolvable:$true] %s548_s28 }
  0x52   :  { %265 = vmatpush.msrb.mxu0 %v186_v29  ;;  %285 = vmatpush.msrb.mxu1 %v218_v30  ;;  %v248_v29 = vperm.slane %v246_v28, 0  ;;  %v249_v30 = vperm.slane %v246_v28, 1 }
  0x54   :  { %266 = vmatpush.msrb.mxu0 %v184_v32  ;;  %286 = vmatpush.msrb.mxu1 %v216_v33 }
  0x56   :  { %267 = vmatpush.msrb.mxu0 %v182_v34  ;;  %287 = vmatpush.msrb.mxu1 %v214_v35 }
  0x57   :  { %397 = vmatmul.f32.gmra.mxu2 %v335_v42  ;;  %438 = vmatmul.f32.gmra.mxu3 %v335_v42 }
  0x58   :  { %292 = vmatpush.msra.mxu0 %v213_v36  ;;  %312 = vmatpush.msra.mxu1 %v245_v37 }
  0x5a   :  { %293 = vmatpush.msra.mxu0 %v211_v38  ;;  %313 = vmatpush.msra.mxu1 %v243_v39 }
  0x5c   :  { %294 = vmatpush.msra.mxu0 %v209_v40  ;;  %314 = vmatpush.msra.mxu1 %v241_v41 }
  0x5e   :  { %295 = vmatpush.msra.mxu0 %v207_v43  ;;  %315 = vmatpush.msra.mxu1 %v239_v44 }
  0x5f   :  { %400 = vmatmul.f32.gmra.mxu2 %v336_v51  ;;  %441 = vmatmul.f32.gmra.mxu3 %v336_v51 }
  0x60   :  { %296 = vmatpush.msra.mxu0 %v205_v45  ;;  %316 = vmatpush.msra.mxu1 %v237_v46 }
  0x62   :  { %297 = vmatpush.msra.mxu0 %v203_v47  ;;  %317 = vmatpush.msra.mxu1 %v235_v48 }
  0x64   :  { %298 = vmatpush.msra.mxu0 %v201_v49  ;;  %318 = vmatpush.msra.mxu1 %v233_v50 }
  0x66   :  { %299 = vmatpush.msra.mxu0 %v199_v52  ;;  %319 = vmatpush.msra.mxu1 %v231_v53 }
  0x67   :  { %403 = vmatmul.f32.gmra.mxu2 %v337_v60  ;;  %444 = vmatmul.f32.gmra.mxu3 %v337_v60 }
  0x68   :  { %300 = vmatpush.msra.mxu0 %v197_v54  ;;  %320 = vmatpush.msra.mxu1 %v229_v55 }
  0x6a   :  { %301 = vmatpush.msra.mxu0 %v195_v56  ;;  %321 = vmatpush.msra.mxu1 %v227_v57 }
  0x6c   :  { %302 = vmatpush.msra.mxu0 %v193_v58  ;;  %322 = vmatpush.msra.mxu1 %v225_v59 }
  0x6e   :  { %303 = vmatpush.msra.mxu0 %v191_v61  ;;  %323 = vmatpush.msra.mxu1 %v223_v62 }
  0x6f   :  { %406 = vmatmul.f32.gmra.mxu2 %v338_v5  ;;  %447 = vmatmul.f32.gmra.mxu3 %v338_v5 }
  0x70   :  { %304 = vmatpush.msra.mxu0 %v189_v63  ;;  %324 = vmatpush.msra.mxu1 %v221_v0 }
  0x72   :  { %305 = vmatpush.msra.mxu0 %v187_v1  ;;  %325 = vmatpush.msra.mxu1 %v219_v2 }
  0x74   :  { %306 = vmatpush.msra.mxu0 %v185_v3  ;;  %326 = vmatpush.msra.mxu1 %v217_v4 }
  0x76   :  { %307 = vmatpush.msra.mxu0 %v183_v6  ;;  %327 = vmatpush.msra.mxu1 %v215_v7 }
  0x77   :  { %409 = vmatmul.f32.gmra.mxu2 %v339_v8  ;;  %450 = vmatmul.f32.gmra.mxu3 %v339_v8 }
  0xb4   :  { %v159_v12 = vpop.f32.mrf.mxu0  ;;  %v179_v13 = vpop.f32.mrf.mxu1 }
  0xb5   :  { %v160_v14 = vadd.f32 %v159_v12, %v138_v10  ;;  %v180_v15 = vadd.f32 %v179_v13, %v139_v11 }
  0xb7   :  { %268 = vmatmul.f32.vlgmr.msrb.gmra.mxu0 %v160_v14  ;;  %288 = vmatmul.f32.vlgmr.msrb.gmra.mxu1 %v180_v15 }
  0xbf   :  { %308 = vmatmul.f32.vlgmr.msra.gmra.mxu0 %v160_v14  ;;  %328 = vmatmul.f32.vlgmr.msra.gmra.mxu1 %v180_v15 }
  0xc2   :  { %v389_v16 = vpop.f32.mrf.mxu2  ;;  %v430_v17 = vpop.f32.mrf.mxu3 }
  0xca   :  { %v392_v18 = vpop.f32.mrf.mxu2  ;;  %v433_v19 = vpop.f32.mrf.mxu3 }
  0xd2   :  { %v395_v20 = vpop.f32.mrf.mxu2  ;;  %v436_v21 = vpop.f32.mrf.mxu3 }
  0xda   :  { %v398_v22 = vpop.f32.mrf.mxu2  ;;  %v804_v23 = vpop.f32.mrf.mxu3 }
  0xe2   :  { %v806_v24 = vpop.f32.mrf.mxu2  ;;  %v808_v25 = vpop.f32.mrf.mxu3 }
  0xea   :  { %v404_v33 = vpop.f32.mrf.mxu2  ;;  %v813_v35 = vpop.f32.mrf.mxu3 }
  0xf2   :  { %v407_v56 = vpop.f32.mrf.mxu2  ;;  %v448_v60 = vpop.f32.mrf.mxu3 }
 0x134   :  { %v269_v26 = vpop.f32.mrf.mxu0  ;;  %v289_v27 = vpop.f32.mrf.mxu1 }
 0x135   :  { %v270_v32 = vadd.f32 %v269_v26, %v248_v29 }
 0x137   :  { %v290_v38 = vadd.f32 %v289_v27, %v270_v32 }
 0x13c   :  { %v309_v31 = vpop.f32.mrf.mxu0  ;;  %v329_v36 = vpop.f32.mrf.mxu1 }
 0x13d   :  { %v310_v34 = vadd.f32 %v309_v31, %v249_v30 }
 0x13f   :  { %v330_v37 = vadd.f32 %v329_v36, %v310_v34 }
 0x141   :  { %v456_v39 = vrot.slane %v330_v37, 7 }
 0x143   :  { %v458_v40 = vsel %vm457_vm0, %v290_v38, %v456_v39  ;;  %v460_v41 = vsel %vm459_vm1, %v290_v38, %v456_v39  ;;  %v463_v42 = vsel %vm462_vm2, %v290_v38, %v456_v39  ;;  %v466_v43 = vsel %vm465_vm3, %v290_v38, %v456_v39 }
 0x144   :  { %v461_v44 = vrot.slane %v460_v41, 1  ;;  %v464_v45 = vrot.slane %v463_v42, 2  ;;  %v467_v46 = vrot.slane %v466_v43, 3  ;;  %v469_v47 = vsel %vm468_vm4, %v290_v38, %v456_v39 }
 0x145   :  { %v472_v48 = vsel %vm471_vm5, %v290_v38, %v456_v39  ;;  %v480_v49 = vperm.slane %v458_v40, 0  ;;  %v481_v50 = vperm.slane %v458_v40, 1  ;;  %v470_v51 = vrot.slane %v469_v47, 4 }
 0x146   :  { %v482_v52 = vperm.slane %v461_v44, 0  ;;  %v483_v53 = vperm.slane %v461_v44, 1  ;;  %v484_v54 = vperm.slane %v464_v45, 0  ;;  %v485_v55 = vperm.slane %v464_v45, 1 }
 0x147   :  { %v473_v57 = vrot.slane %v472_v48, 5  ;;  %v486_v58 = vperm.slane %v467_v46, 0  ;;  %v512_v59 = vadd.f32 %v480_v49, %v389_v16  ;;  %v487_v61 = vperm.slane %v467_v46, 1 }
 0x148   :  { %v513_v62 = vadd.f32 %v481_v50, %v430_v17  ;;  %v514_v63 = vadd.f32 %v482_v52, %v392_v18  ;;  %v515_v0 = vadd.f32 %v483_v53, %v433_v19  ;;  %v488_v1 = vperm.slane %v470_v51, 0 }
 0x149   :  { %v516_v2 = vadd.f32 %v484_v54, %v395_v20  ;;  %528 = vst [vmem:[#allocation11] sm:$0xff] %v512_v59  ;;  %v489_v3 = vperm.slane %v470_v51, 1  ;;  %v517_v4 = vadd.f32 %v485_v55, %v436_v21  ;;  %v475_v5 = vsel %vm474_vm6, %v290_v38, %v456_v39  ;;  %v410_v20 = vpop.f32.mrf.mxu2 }
 0x14a   :  { %529 = vst [vmem:[#allocation11 + $0x8] sm:$0xff] %v513_v62  ;;  %v490_v6 = vperm.slane %v473_v57, 0  ;;  %v518_v7 = vadd.f32 %v486_v58, %v398_v22  ;;  %v476_v8 = vrot.slane %v475_v5, 6  ;;  %v478_v9 = vsel %vm477_vm7, %v456_v39, %v290_v38 }
 0x14b   :  { %530 = vst [vmem:[#allocation11 + $0x10] sm:$0xff] %v514_v63  ;;  %v491_v10 = vperm.slane %v473_v57, 1  ;;  %v519_v11 = vadd.f32 %v487_v61, %v804_v23  ;;  %v479_v12 = vrot.slane %v478_v9, 7  ;;  %v520_v13 = vadd.f32 %v488_v1, %v806_v24  ;;  %v451_v23 = vpop.f32.mrf.mxu3 }
 0x14c   :  { %531 = vst [vmem:[#allocation11 + $0x18] sm:$0xff] %v515_v0  ;;  %v492_v14 = vperm.slane %v476_v8, 0  ;;  %v521_v15 = vadd.f32 %v489_v3, %v808_v25  ;;  %v493_v16 = vperm.slane %v476_v8, 1  ;;  %v522_v17 = vadd.f32 %v490_v6, %v404_v33 }
 0x14d   :  { %532 = vst [vmem:[#allocation11 + $0x20] sm:$0xff] %v516_v2  ;;  %v494_v18 = vperm.slane %v479_v12, 0  ;;  %v523_v19 = vadd.f32 %v491_v10, %v813_v35  ;;  %v495_v21 = vperm.slane %v479_v12, 1 }
 0x14e   :  { %533 = vst [vmem:[#allocation11 + $0x28] sm:$0xff] %v517_v4  ;;  %v524_v22 = vadd.f32 %v492_v14, %v407_v56  ;;  %v525_v26 = vadd.f32 %v493_v16, %v448_v60 }
 0x14f   :  { %534 = vst [vmem:[#allocation11 + $0x30] sm:$0xff] %v518_v7  ;;  %v526_v24 = vadd.f32 %v494_v18, %v410_v20  ;;  %v527_v25 = vadd.f32 %v495_v21, %v451_v23 }
 0x150   :  { %535 = vst [vmem:[#allocation11 + $0x38] sm:$0xff] %v519_v11 }
 0x151   :  { %536 = vst [vmem:[#allocation11 + $0x40] sm:$0xff] %v520_v13 }
 0x152   :  { %537 = vst [vmem:[#allocation11 + $0x48] sm:$0xff] %v521_v15 }
 0x153   :  { %538 = vst [vmem:[#allocation11 + $0x50] sm:$0xff] %v522_v17 }
 0x154   :  { %539 = vst [vmem:[#allocation11 + $0x58] sm:$0xff] %v523_v19 }
 0x155   :  { %540 = vst [vmem:[#allocation11 + $0x60] sm:$0xff] %v524_v22 }
 0x156   :  { %541 = vst [vmem:[#allocation11 + $0x68] sm:$0xff] %v525_v26 }
 0x157   :  { %542 = vst [vmem:[#allocation11 + $0x70] sm:$0xff] %v526_v24 }
 0x158   :  { %543 = vst [vmem:[#allocation11 + $0x78] sm:$0xff] %v527_v25 }
 0x159   :  { %556 = dma.vmem_to_hbm [thread:$0]  %s549_s28, 2048, %s551_s8, [#allocation4], %s729_s1, %s729_s1, %s730_s14  }
 0x15a   :  { %725 = dma.done.wait [#allocation4], 2048  }
 0x15b   :  { %726 = vsyncadd [#allocation4], 4294965248 }
 0x15c   :  { %561 = vsyncpa [#allocation3], 1 }
 0x15d   :  { %562 = vsyncpa [#allocation6], 1 }
 0x15e   :  { %563 = vsyncpa [#allocation9], 1 }
 0x15f   :  { %564 = vsyncpa [#allocation4], 1 }

// kernel: tpu_custom_call.1
= control target key start
LH: loop header
LB: loop body
LE: loop exit
PB: predicated region body
PF: predicated region fallthrough
CT: control target
= control target key end

     0   :  { %12 = vsyncpa [#allocation3], 0  ;;  %s827_s0 = inlined_call_operand.hbm [shape: f32[8,8,128], index: 0, kind: input, shape index: {}]   ;;  %s828_s1 = inlined_call_operand.hbm [shape: f32[8,128], index: 1, kind: input, shape index: {}]   ;;  %s829_s2 = inlined_call_operand.hbm [shape: f32[128,256], index: 2, kind: input, shape index: {}]   ;;  %s830_s3 = inlined_call_operand.vmem [shape: f32[1,256], index: 3, kind: input, shape index: {}]   ;;  %s831_s4 = inlined_call_operand.hbm [shape: f32[128,256], index: 4, kind: input, shape index: {}]   ;;  %s832_s5 = inlined_call_operand.hbm [shape: f32[256,256], index: 5, kind: input, shape index: {}]   ;;  %s833_s6 = inlined_call_operand.vmem [shape: f32[1,256], index: 6, kind: input, shape index: {}]   ;;  %s834_s7 = inlined_call_operand.hbm [shape: f32[8,8,256], index: 7, kind: output, shape index: {}]  }
   0x1   :  { %13 = vsyncpa [#allocation6], 0 }
   0x2   :  { %14 = vsyncpa [#allocation9], 0  ;;  %s34_s26 = sshll.u32 %s828_s1, 4  ;;  %s35_s26 = int_to_ptr.hbm [resolvable:$true] %s34_s26 }
   0x3   :  { %15 = vsyncpa [#allocation4], 0  ;;  %s727_s27 = smov [#allocation5]   ;;  %s59_s8 = sshll.u32 %s831_s4, 4  ;;  %s60_s8 = int_to_ptr.hbm [resolvable:$true] %s59_s8 }
   0x4   :  { %s36_s28 = sshll.u32 %s727_s27, 4  ;;  %s728_s9 = smov [#allocation8]   ;;  %s37_s28 = int_to_ptr.vmem [resolvable:$true] %s36_s28 }
   0x5   :  { %39 = dma.hbm_to_vmem [thread:$0]  %s35_s26, 128, %s37_s28, [#allocation6]  }
   0x6   :  { %s61_s10 = sshll.u32 %s728_s9, 4  ;;  %s20_s13 = sshll.u32 %s827_s0, 4  ;;  %s62_s10 = int_to_ptr.vmem [resolvable:$true] %s61_s10  ;;  %s21_s13 = int_to_ptr.hbm [resolvable:$true] %s20_s13 }
   0x7   :  { %s729_s1 = smov 256   ;;  %s730_s14 = smov 16  }
   0x8   :  { %67 = dma.hbm_to_vmem [thread:$0]  %s60_s8, 4096, %s62_s10, [#allocation9], %s729_s1, %s729_s1, %s730_s14  }
   0x9   :  { %s731_s15 = smov [#allocation2]   ;;  %s44_s18 = sshll.u32 %s829_s2, 4  ;;  %s45_s18 = int_to_ptr.hbm [resolvable:$true] %s44_s18 }
   0xa   :  { %s22_s16 = sshll.u32 %s731_s15, 4  ;;  %s732_s19 = smov 128   ;;  %s23_s16 = int_to_ptr.vmem [resolvable:$true] %s22_s16 }
   0xb   :  { %s733_s20 = smov 8   ;;  %s734_s0 = smov [#allocation7]  }
   0xc   :  { %28 = dma.hbm_to_vmem [thread:$0]  %s21_s13, 1024, %s23_s16, [#allocation3], %s732_s19, %s732_s19, %s733_s20  }
   0xd   :  { %s46_s21 = sshll.u32 %s734_s0, 4  ;;  %s72_s24 = sshll.u32 %s832_s5, 4  ;;  %s47_s21 = int_to_ptr.vmem [resolvable:$true] %s46_s21  ;;  %s73_s24 = int_to_ptr.hbm [resolvable:$true] %s72_s24 }
   0xe   :  { %52 = dma.hbm_to_vmem [thread:$0]  %s45_s18, 4096, %s47_s21, [#allocation6], %s729_s1, %s729_s1, %s730_s14  }
   0xf   :  { %s735_s25 = smov [#allocation10]  }
  0x10   :  { %s74_s26 = sshll.u32 %s735_s25, 4  ;;  %s75_s26 = int_to_ptr.vmem [resolvable:$true] %s74_s26 }
  0x11   :  { %80 = dma.hbm_to_vmem [thread:$0]  %s73_s24, 8192, %s75_s26, [#allocation9], %s729_s1, %s729_s1, %s730_s14  }
  0x12   :  { %719 = dma.done.wait [#allocation3], 1024  }
  0x13   :  { %720 = vsyncadd [#allocation3], 4294966272 }
  0x14   :  { %721 = dma.done.wait [#allocation6], 4224  }
  0x15   :  { %722 = vsyncadd [#allocation6], 4294963072 }
  0x16   :  { %723 = dma.done.wait [#allocation9], 12288  }
  0x17   :  { %724 = vsyncadd [#allocation9], 4294955008  ;;  %v134_v0 = vld [vmem:[#allocation7 + $0xf0] sm:$0xff]  ;;  %v135_v1 = vld [vmem:[#allocation7 + $0xf8] sm:$0xff]  ;;  %vm457_vm0 = vcmask 1040384   ;;  %vm459_vm1 = vcmask 1041409  }
  0x18   :  { %v132_v2 = vld [vmem:[#allocation7 + $0xe0] sm:$0xff]  ;;  %142 = vmatpush.msra.mxu0 %v134_v0  ;;  %162 = vmatpush.msra.mxu1 %v135_v1  ;;  %v133_v3 = vld [vmem:[#allocation7 + $0xe8] sm:$0xff]  ;;  %v130_v4 = vld [vmem:[#allocation7 + $0xd0] sm:$0xff]  ;;  %vm462_vm2 = vcmask 1042434   ;;  %vm465_vm3 = vcmask 1043459   ;;  %vm468_vm4 = vcmask 1044484  }
  0x19   :  { %v131_v5 = vld [vmem:[#allocation7 + $0xd8] sm:$0xff]  ;;  %v128_v6 = vld [vmem:[#allocation7 + $0xc0] sm:$0xff]  ;;  %v129_v7 = vld [vmem:[#allocation7 + $0xc8] sm:$0xff]  ;;  %vm471_vm5 = vcmask 1045509   ;;  %vm474_vm6 = vcmask 1046534   ;;  %vm477_vm7 = vcmask 1046528  }
  0x1a   :  { %143 = vmatpush.msra.mxu0 %v132_v2  ;;  %163 = vmatpush.msra.mxu1 %v133_v3  ;;  %v126_v8 = vld [vmem:[#allocation7 + $0xb0] sm:$0xff]  ;;  %v127_v9 = vld [vmem:[#allocation7 + $0xb8] sm:$0xff]  ;;  %v124_v10 = vld [vmem:[#allocation7 + $0xa0] sm:$0xff]  ;;  %s550_s8 = sshll.u32 %s834_s7, 4  ;;  %s551_s8 = int_to_ptr.hbm [resolvable:$true] %s550_s8 }
  0x1b   :  { %v125_v11 = vld [vmem:[#allocation7 + $0xa8] sm:$0xff]  ;;  %v122_v12 = vld [vmem:[#allocation7 + $0x90] sm:$0xff]  ;;  %v123_v13 = vld [vmem:[#allocation7 + $0x98] sm:$0xff] }
  0x1c   :  { %144 = vmatpush.msra.mxu0 %v130_v4  ;;  %164 = vmatpush.msra.mxu1 %v131_v5  ;;  %v370_v14 = vld [vmem:[#allocation8 + $0xf0] sm:$0xff]  ;;  %v371_v15 = vld [vmem:[#allocation8 + $0xf8] sm:$0xff]  ;;  %v368_v16 = vld [vmem:[#allocation8 + $0xe0] sm:$0xff] }
  0x1d   :  { %v120_v17 = vld [vmem:[#allocation7 + $0x80] sm:$0xff]  ;;  %v121_v18 = vld [vmem:[#allocation7 + $0x88] sm:$0xff]  ;;  %372 = vmatpush.msra.mxu2 %v370_v14  ;;  %413 = vmatpush.msra.mxu3 %v371_v15  ;;  %v366_v20 = vld [vmem:[#allocation8 + $0xd0] sm:$0xff] }
  0x1e   :  { %145 = vmatpush.msra.mxu0 %v128_v6  ;;  %165 = vmatpush.msra.mxu1 %v129_v7  ;;  %v369_v19 = vld [vmem:[#allocation8 + $0xe8] sm:$0xff]  ;;  %v367_v21 = vld [vmem:[#allocation8 + $0xd8] sm:$0xff]  ;;  %v118_v22 = vld [vmem:[#allocation7 + $0x70] sm:$0xff] }
  0x1f   :  { %v119_v23 = vld [vmem:[#allocation7 + $0x78] sm:$0xff]  ;;  %373 = vmatpush.msra.mxu2 %v368_v16  ;;  %414 = vmatpush.msra.mxu3 %v369_v19  ;;  %v364_v24 = vld [vmem:[#allocation8 + $0xc0] sm:$0xff]  ;;  %v365_v25 = vld [vmem:[#allocation8 + $0xc8] sm:$0xff] }
  0x20   :  { %146 = vmatpush.msra.mxu0 %v126_v8  ;;  %166 = vmatpush.msra.mxu1 %v127_v9  ;;  %v116_v26 = vld [vmem:[#allocation7 + $0x60] sm:$0xff]  ;;  %v117_v27 = vld [vmem:[#allocation7 + $0x68] sm:$0xff]  ;;  %v362_v28 = vld [vmem:[#allocation8 + $0xb0] sm:$0xff] }
  0x21   :  { %374 = vmatpush.msra.mxu2 %v366_v20  ;;  %415 = vmatpush.msra.mxu3 %v367_v21  ;;  %v363_v29 = vld [vmem:[#allocation8 + $0xb8] sm:$0xff]  ;;  %v114_v30 = vld [vmem:[#allocation7 + $0x50] sm:$0xff]  ;;  %v360_v32 = vld [vmem:[#allocation8 + $0xa0] sm:$0xff] }
  0x22   :  { %147 = vmatpush.msra.mxu0 %v124_v10  ;;  %167 = vmatpush.msra.mxu1 %v125_v11  ;;  %v115_v31 = vld [vmem:[#allocation7 + $0x58] sm:$0xff]  ;;  %v361_v33 = vld [vmem:[#allocation8 + $0xa8] sm:$0xff]  ;;  %v112_v34 = vld [vmem:[#allocation7 + $0x40] sm:$0xff] }
  0x23   :  { %375 = vmatpush.msra.mxu2 %v364_v24  ;;  %416 = vmatpush.msra.mxu3 %v365_v25  ;;  %v113_v35 = vld [vmem:[#allocation7 + $0x48] sm:$0xff]  ;;  %v358_v36 = vld [vmem:[#allocation8 + $0x90] sm:$0xff]  ;;  %v359_v37 = vld [vmem:[#allocation8 + $0x98] sm:$0xff] }
  0x24   :  { %148 = vmatpush.msra.mxu0 %v122_v12  ;;  %168 = vmatpush.msra.mxu1 %v123_v13  ;;  %v110_v38 = vld [vmem:[#allocation7 + $0x30] sm:$0xff]  ;;  %v111_v39 = vld [vmem:[#allocation7 + $0x38] sm:$0xff]  ;;  %v356_v40 = vld [vmem:[#allocation8 + $0x80] sm:$0xff] }
  0x25   :  { %376 = vmatpush.msra.mxu2 %v362_v28  ;;  %417 = vmatpush.msra.mxu3 %v363_v29  ;;  %v357_v41 = vld [vmem:[#allocation8 + $0x88] sm:$0xff]  ;;  %v108_v42 = vld [vmem:[#allocation7 + $0x20] sm:$0xff]  ;;  %v354_v44 = vld [vmem:[#allocation8 + $0x70] sm:$0xff] }
  0x26   :  { %149 = vmatpush.msra.mxu0 %v120_v17  ;;  %169 = vmatpush.msra.mxu1 %v121_v18  ;;  %v109_v43 = vld [vmem:[#allocation7 + $0x28] sm:$0xff]  ;;  %v355_v45 = vld [vmem:[#allocation8 + $0x78] sm:$0xff]  ;;  %v106_v46 = vld [vmem:[#allocation7 + $0x10] sm:$0xff] }
  0x27   :  { %377 = vmatpush.msra.mxu2 %v360_v32  ;;  %418 = vmatpush.msra.mxu3 %v361_v33  ;;  %v107_v47 = vld [vmem:[#allocation7 + $0x18] sm:$0xff]  ;;  %v352_v48 = vld [vmem:[#allocation8 + $0x60] sm:$0xff]  ;;  %v353_v49 = vld [vmem:[#allocation8 + $0x68] sm:$0xff] }
  0x28   :  { %150 = vmatpush.msra.mxu0 %v118_v22  ;;  %170 = vmatpush.msra.mxu1 %v119_v23  ;;  %v104_v50 = vld [vmem:[#allocation7] sm:$0xff]  ;;  %v105_v51 = vld [vmem:[#allocation7 + $0x8] sm:$0xff]  ;;  %v103_v52 = vld [vmem:[#allocation5] sm:$0xff] }
  0x29   :  { %378 = vmatpush.msra.mxu2 %v358_v36  ;;  %419 = vmatpush.msra.mxu3 %v359_v37  ;;  %v212_v53 = vld [vmem:[#allocation10 + $0xf0] sm:$0xff]  ;;  %v351_v56 = vld [vmem:[#allocation8 + $0x58] sm:$0xff]  ;;  %v210_v57 = vld [vmem:[#allocation10 + $0xe0] sm:$0xff] }
  0x2a   :  { %151 = vmatpush.msra.mxu0 %v116_v26  ;;  %171 = vmatpush.msra.mxu1 %v117_v27  ;;  %v244_v54 = vld [vmem:[#allocation10 + $0x1f0] sm:$0xff]  ;;  %v242_v58 = vld [vmem:[#allocation10 + $0x1e0] sm:$0xff]  ;;  %v349_v60 = vld [vmem:[#allocation8 + $0x48] sm:$0xff] }
  0x2b   :  { %379 = vmatpush.msra.mxu2 %v356_v40  ;;  %420 = vmatpush.msra.mxu3 %v357_v41  ;;  %v350_v55 = vld [vmem:[#allocation8 + $0x50] sm:$0xff]  ;;  %v348_v59 = vld [vmem:[#allocation8 + $0x40] sm:$0xff]  ;;  %v347_v0 = vld [vmem:[#allocation8 + $0x38] sm:$0xff] }
  0x2c   :  { %152 = vmatpush.msra.mxu0 %v114_v30  ;;  %172 = vmatpush.msra.mxu1 %v115_v31  ;;  %v208_v61 = vld [vmem:[#allocation10 + $0xd0] sm:$0xff]  ;;  %v206_v1 = vld [vmem:[#allocation10 + $0xc0] sm:$0xff]  ;;  %v345_v4 = vld [vmem:[#allocation8 + $0x28] sm:$0xff] }
  0x2d   :  { %380 = vmatpush.msra.mxu2 %v354_v44  ;;  %421 = vmatpush.msra.mxu3 %v355_v45  ;;  %v240_v62 = vld [vmem:[#allocation10 + $0x1d0] sm:$0xff]  ;;  %v238_v2 = vld [vmem:[#allocation10 + $0x1c0] sm:$0xff]  ;;  %v343_v8 = vld [vmem:[#allocation8 + $0x18] sm:$0xff] }
  0x2e   :  { %153 = vmatpush.msra.mxu0 %v112_v34  ;;  %173 = vmatpush.msra.mxu1 %v113_v35  ;;  %v346_v63 = vld [vmem:[#allocation8 + $0x30] sm:$0xff]  ;;  %v344_v3 = vld [vmem:[#allocation8 + $0x20] sm:$0xff]  ;;  %v341_v12 = vld [vmem:[#allocation8 + $0x8] sm:$0xff] }
  0x2f   :  { %381 = vmatpush.msra.mxu2 %v352_v48  ;;  %422 = vmatpush.msra.mxu3 %v353_v49  ;;  %v204_v5 = vld [vmem:[#allocation10 + $0xb0] sm:$0xff]  ;;  %v202_v9 = vld [vmem:[#allocation10 + $0xa0] sm:$0xff]  ;;  %v332_v13 = vld [vmem:[#allocation2] sm:$0xff] }
  0x30   :  { %154 = vmatpush.msra.mxu0 %v110_v38  ;;  %174 = vmatpush.msra.mxu1 %v111_v39  ;;  %v236_v6 = vld [vmem:[#allocation10 + $0x1b0] sm:$0xff]  ;;  %v234_v10 = vld [vmem:[#allocation10 + $0x1a0] sm:$0xff]  ;;  %v334_v31 = vld [vmem:[#allocation2 + $0x10] sm:$0xff] }
  0x31   :  { %382 = vmatpush.msra.mxu2 %v350_v55  ;;  %423 = vmatpush.msra.mxu3 %v351_v56  ;;  %v342_v7 = vld [vmem:[#allocation8 + $0x10] sm:$0xff]  ;;  %v340_v11 = vld [vmem:[#allocation8] sm:$0xff]  ;;  %v213_v36 = vld [vmem:[#allocation10 + $0xf8] sm:$0xff] }
  0x32   :  { %155 = vmatpush.msra.mxu0 %v108_v42  ;;  %175 = vmatpush.msra.mxu1 %v109_v43  ;;  %v200_v14 = vld [vmem:[#allocation10 + $0x90] sm:$0xff]  ;;  %v198_v16 = vld [vmem:[#allocation10 + $0x80] sm:$0xff]  ;;  %v245_v37 = vld [vmem:[#allocation10 + $0x1f8] sm:$0xff] }
  0x33   :  { %383 = vmatpush.msra.mxu2 %v348_v59  ;;  %424 = vmatpush.msra.mxu3 %v349_v60  ;;  %v232_v15 = vld [vmem:[#allocation10 + $0x190] sm:$0xff]  ;;  %v230_v17 = vld [vmem:[#allocation10 + $0x180] sm:$0xff]  ;;  %v211_v38 = vld [vmem:[#allocation10 + $0xe8] sm:$0xff] }
  0x34   :  { %156 = vmatpush.msra.mxu0 %v106_v46  ;;  %176 = vmatpush.msra.mxu1 %v107_v47  ;;  %v196_v18 = vld [vmem:[#allocation10 + $0x70] sm:$0xff]  ;;  %v194_v20 = vld [vmem:[#allocation10 + $0x60] sm:$0xff]  ;;  %v243_v39 = vld [vmem:[#allocation10 + $0x1e8] sm:$0xff] }
  0x35   :  { %384 = vmatpush.msra.mxu2 %v346_v63  ;;  %425 = vmatpush.msra.mxu3 %v347_v0  ;;  %v228_v19 = vld [vmem:[#allocation10 + $0x170] sm:$0xff]  ;;  %v226_v21 = vld [vmem:[#allocation10 + $0x160] sm:$0xff]  ;;  %v209_v40 = vld [vmem:[#allocation10 + $0xd8] sm:$0xff] }
  0x36   :  { %157 = vmatpush.msra.mxu0 %v104_v50  ;;  %177 = vmatpush.msra.mxu1 %v105_v51  ;;  %v333_v22 = vld [vmem:[#allocation2 + $0x8] sm:$0xff]  ;;  %v192_v23 = vld [vmem:[#allocation10 + $0x50] sm:$0xff]  ;;  %v241_v41 = vld [vmem:[#allocation10 + $0x1d8] sm:$0xff] }
  0x37   :  { %158 = vmatmul.f32.vlgmr.msra.gmra.mxu0 %v103_v52  ;;  %178 = vmatmul.f32.vlgmr.msra.gmra.mxu1 %v103_v52  ;;  %v224_v24 = vld [vmem:[#allocation10 + $0x150] sm:$0xff]  ;;  %v190_v25 = vld [vmem:[#allocation10 + $0x40] sm:$0xff]  ;;  %v207_v43 = vld [vmem:[#allocation10 + $0xc8] sm:$0xff] }
  0x38   :  { %252 = vmatpush.msrb.mxu0 %v212_v53  ;;  %272 = vmatpush.msrb.mxu1 %v244_v54  ;;  %v222_v26 = vld [vmem:[#allocation10 + $0x140] sm:$0xff]  ;;  %v188_v27 = vld [vmem:[#allocation10 + $0x30] sm:$0xff]  ;;  %v239_v44 = vld [vmem:[#allocation10 + $0x1c8] sm:$0xff] }
  0x39   :  { %385 = vmatpush.msra.mxu2 %v344_v3  ;;  %426 = vmatpush.msra.mxu3 %v345_v4  ;;  %v220_v28 = vld [vmem:[#allocation10 + $0x130] sm:$0xff]  ;;  %v186_v29 = vld [vmem:[#allocation10 + $0x20] sm:$0xff]  ;;  %v205_v45 = vld [vmem:[#allocation10 + $0xb8] sm:$0xff] }
  0x3a   :  { %253 = vmatpush.msrb.mxu0 %v210_v57  ;;  %273 = vmatpush.msrb.mxu1 %v242_v58  ;;  %v218_v30 = vld [vmem:[#allocation10 + $0x120] sm:$0xff]  ;;  %v184_v32 = vld [vmem:[#allocation10 + $0x10] sm:$0xff]  ;;  %v237_v46 = vld [vmem:[#allocation10 + $0x1b8] sm:$0xff] }
  0x3b   :  { %386 = vmatpush.msra.mxu2 %v342_v7  ;;  %427 = vmatpush.msra.mxu3 %v343_v8  ;;  %v216_v33 = vld [vmem:[#allocation10 + $0x110] sm:$0xff]  ;;  %v182_v34 = vld [vmem:[#allocation10] sm:$0xff]  ;;  %v203_v47 = vld [vmem:[#allocation10 + $0xa8] sm:$0xff] }
  0x3c   :  { %254 = vmatpush.msrb.mxu0 %v208_v61  ;;  %274 = vmatpush.msrb.mxu1 %v240_v62  ;;  %v214_v35 = vld [vmem:[#allocation10 + $0x100] sm:$0xff]  ;;  %v335_v42 = vld [vmem:[#allocation2 + $0x18] sm:$0xff]  ;;  %v235_v48 = vld [vmem:[#allocation10 + $0x1a8] sm:$0xff] }
  0x3d   :  { %387 = vmatpush.msra.mxu2 %v340_v11  ;;  %428 = vmatpush.msra.mxu3 %v341_v12  ;;  %v201_v49 = vld [vmem:[#allocation10 + $0x98] sm:$0xff]  ;;  %v199_v52 = vld [vmem:[#allocation10 + $0x88] sm:$0xff]  ;;  %v337_v60 = vld [vmem:[#allocation2 + $0x28] sm:$0xff] }
  0x3e   :  { %255 = vmatpush.msrb.mxu0 %v206_v1  ;;  %275 = vmatpush.msrb.mxu1 %v238_v2  ;;  %v233_v50 = vld [vmem:[#allocation10 + $0x198] sm:$0xff]  ;;  %v231_v53 = vld [vmem:[#allocation10 + $0x188] sm:$0xff]  ;;  %v339_v8 = vld [vmem:[#allocation2 + $0x38] sm:$0xff] }
  0x3f   :  { %388 = vmatmul.f32.vlgmr.msra.gmra.mxu2 %v332_v13  ;;  %429 = vmatmul.f32.vlgmr.msra.gmra.mxu3 %v332_v13  ;;  %v336_v51 = vld [vmem:[#allocation2 + $0x20] sm:$0xff]  ;;  %v195_v56 = vld [vmem:[#allocation10 + $0x68] sm:$0xff] }
  0x40   :  { %256 = vmatpush.msrb.mxu0 %v204_v5  ;;  %276 = vmatpush.msrb.mxu1 %v236_v6  ;;  %v197_v54 = vld [vmem:[#allocation10 + $0x78] sm:$0xff]  ;;  %v227_v57 = vld [vmem:[#allocation10 + $0x168] sm:$0xff] }
  0x41   :  { %v229_v55 = vld [vmem:[#allocation10 + $0x178] sm:$0xff]  ;;  %v191_v61 = vld [vmem:[#allocation10 + $0x48] sm:$0xff] }
  0x42   :  { %257 = vmatpush.msrb.mxu0 %v202_v9  ;;  %277 = vmatpush.msrb.mxu1 %v234_v10  ;;  %v193_v58 = vld [vmem:[#allocation10 + $0x58] sm:$0xff]  ;;  %v223_v62 = vld [vmem:[#allocation10 + $0x148] sm:$0xff] }
  0x43   :  { %v225_v59 = vld [vmem:[#allocation10 + $0x158] sm:$0xff]  ;;  %v187_v1 = vld [vmem:[#allocation10 + $0x28] sm:$0xff] }
  0x44   :  { %258 = vmatpush.msrb.mxu0 %v200_v14  ;;  %278 = vmatpush.msrb.mxu1 %v232_v15  ;;  %v189_v63 = vld [vmem:[#allocation10 + $0x38] sm:$0xff]  ;;  %v219_v2 = vld [vmem:[#allocation10 + $0x128] sm:$0xff] }
  0x45   :  { %v221_v0 = vld [vmem:[#allocation10 + $0x138] sm:$0xff]  ;;  %v338_v5 = vld [vmem:[#allocation2 + $0x30] sm:$0xff] }
  0x46   :  { %259 = vmatpush.msrb.mxu0 %v198_v16  ;;  %279 = vmatpush.msrb.mxu1 %v230_v17  ;;  %v185_v3 = vld [vmem:[#allocation10 + $0x18] sm:$0xff]  ;;  %v183_v6 = vld [vmem:[#allocation10 + $0x8] sm:$0xff] }
  0x47   :  { %391 = vmatmul.f32.gmra.mxu2 %v333_v22  ;;  %432 = vmatmul.f32.gmra.mxu3 %v333_v22  ;;  %v217_v4 = vld [vmem:[#allocation10 + $0x118] sm:$0xff]  ;;  %v215_v7 = vld [vmem:[#allocation10 + $0x108] sm:$0xff] }
  0x48   :  { %260 = vmatpush.msrb.mxu0 %v196_v18  ;;  %280 = vmatpush.msrb.mxu1 %v228_v19  ;;  %v136_v9 = vld [vmem:[%s830_s3] sm:$0x3] }
  0x49   :  { %v138_v10 = vperm.slane %v136_v9, 0  ;;  %v139_v11 = vperm.slane %v136_v9, 1 }
  0x4a   :  { %261 = vmatpush.msrb.mxu0 %v194_v20  ;;  %281 = vmatpush.msrb.mxu1 %v226_v21 }
  0x4c   :  { %262 = vmatpush.msrb.mxu0 %v192_v23  ;;  %282 = vmatpush.msrb.mxu1 %v224_v24 }
  0x4e   :  { %263 = vmatpush.msrb.mxu0 %v190_v25  ;;  %283 = vmatpush.msrb.mxu1 %v222_v26 }
  0x4f   :  { %394 = vmatmul.f32.gmra.mxu2 %v334_v31  ;;  %435 = vmatmul.f32.gmra.mxu3 %v334_v31 }
  0x50   :  { %264 = vmatpush.msrb.mxu0 %v188_v27  ;;  %284 = vmatpush.msrb.mxu1 %v220_v28  ;;  %v246_v28 = vld [vmem:[%s833_s6] sm:$0x3]  ;;  %s736_s6 = smov [#allocation11]  }
  0x51   :  { %s548_s28 = sshll.u32 %s736_s6, 4  ;;  %s549_s28 = int_to_ptr.vmem [resolvable:$true] %s548_s28 }
  0x52   :  { %265 = vmatpush.msrb.mxu0 %v186_v29  ;;  %285 = vmatpush.msrb.mxu1 %v218_v30  ;;  %v248_v29 = vperm.slane %v246_v28, 0  ;;  %v249_v30 = vperm.slane %v246_v28, 1 }
  0x54   :  { %266 = vmatpush.msrb.mxu0 %v184_v32  ;;  %286 = vmatpush.msrb.mxu1 %v216_v33 }
  0x56   :  { %267 = vmatpush.msrb.mxu0 %v182_v34  ;;  %287 = vmatpush.msrb.mxu1 %v214_v35 }
  0x57   :  { %397 = vmatmul.f32.gmra.mxu2 %v335_v42  ;;  %438 = vmatmul.f32.gmra.mxu3 %v335_v42 }
  0x58   :  { %292 = vmatpush.msra.mxu0 %v213_v36  ;;  %312 = vmatpush.msra.mxu1 %v245_v37 }
  0x5a   :  { %293 = vmatpush.msra.mxu0 %v211_v38  ;;  %313 = vmatpush.msra.mxu1 %v243_v39 }
  0x5c   :  { %294 = vmatpush.msra.mxu0 %v209_v40  ;;  %314 = vmatpush.msra.mxu1 %v241_v41 }
  0x5e   :  { %295 = vmatpush.msra.mxu0 %v207_v43  ;;  %315 = vmatpush.msra.mxu1 %v239_v44 }
  0x5f   :  { %400 = vmatmul.f32.gmra.mxu2 %v336_v51  ;;  %441 = vmatmul.f32.gmra.mxu3 %v336_v51 }
  0x60   :  { %296 = vmatpush.msra.mxu0 %v205_v45  ;;  %316 = vmatpush.msra.mxu1 %v237_v46 }
  0x62   :  { %297 = vmatpush.msra.mxu0 %v203_v47  ;;  %317 = vmatpush.msra.mxu1 %v235_v48 }
  0x64   :  { %298 = vmatpush.msra.mxu0 %v201_v49  ;;  %318 = vmatpush.msra.mxu1 %v233_v50 }
  0x66   :  { %299 = vmatpush.msra.mxu0 %v199_v52  ;;  %319 = vmatpush.msra.mxu1 %v231_v53 }
  0x67   :  { %403 = vmatmul.f32.gmra.mxu2 %v337_v60  ;;  %444 = vmatmul.f32.gmra.mxu3 %v337_v60 }
  0x68   :  { %300 = vmatpush.msra.mxu0 %v197_v54  ;;  %320 = vmatpush.msra.mxu1 %v229_v55 }
  0x6a   :  { %301 = vmatpush.msra.mxu0 %v195_v56  ;;  %321 = vmatpush.msra.mxu1 %v227_v57 }
  0x6c   :  { %302 = vmatpush.msra.mxu0 %v193_v58  ;;  %322 = vmatpush.msra.mxu1 %v225_v59 }
  0x6e   :  { %303 = vmatpush.msra.mxu0 %v191_v61  ;;  %323 = vmatpush.msra.mxu1 %v223_v62 }
  0x6f   :  { %406 = vmatmul.f32.gmra.mxu2 %v338_v5  ;;  %447 = vmatmul.f32.gmra.mxu3 %v338_v5 }
  0x70   :  { %304 = vmatpush.msra.mxu0 %v189_v63  ;;  %324 = vmatpush.msra.mxu1 %v221_v0 }
  0x72   :  { %305 = vmatpush.msra.mxu0 %v187_v1  ;;  %325 = vmatpush.msra.mxu1 %v219_v2 }
  0x74   :  { %306 = vmatpush.msra.mxu0 %v185_v3  ;;  %326 = vmatpush.msra.mxu1 %v217_v4 }
  0x76   :  { %307 = vmatpush.msra.mxu0 %v183_v6  ;;  %327 = vmatpush.msra.mxu1 %v215_v7 }
  0x77   :  { %409 = vmatmul.f32.gmra.mxu2 %v339_v8  ;;  %450 = vmatmul.f32.gmra.mxu3 %v339_v8 }
  0xb4   :  { %v159_v12 = vpop.f32.mrf.mxu0  ;;  %v179_v13 = vpop.f32.mrf.mxu1 }
  0xb5   :  { %v160_v14 = vadd.f32 %v159_v12, %v138_v10  ;;  %v180_v15 = vadd.f32 %v179_v13, %v139_v11 }
  0xb7   :  { %268 = vmatmul.f32.vlgmr.msrb.gmra.mxu0 %v160_v14  ;;  %288 = vmatmul.f32.vlgmr.msrb.gmra.mxu1 %v180_v15 }
  0xbf   :  { %308 = vmatmul.f32.vlgmr.msra.gmra.mxu0 %v160_v14  ;;  %328 = vmatmul.f32.vlgmr.msra.gmra.mxu1 %v180_v15 }
  0xc2   :  { %v389_v16 = vpop.f32.mrf.mxu2  ;;  %v430_v17 = vpop.f32.mrf.mxu3 }
  0xca   :  { %v392_v18 = vpop.f32.mrf.mxu2  ;;  %v433_v19 = vpop.f32.mrf.mxu3 }
  0xd2   :  { %v395_v20 = vpop.f32.mrf.mxu2  ;;  %v436_v21 = vpop.f32.mrf.mxu3 }
  0xda   :  { %v398_v22 = vpop.f32.mrf.mxu2  ;;  %v804_v23 = vpop.f32.mrf.mxu3 }
  0xe2   :  { %v806_v24 = vpop.f32.mrf.mxu2  ;;  %v808_v25 = vpop.f32.mrf.mxu3 }
  0xea   :  { %v404_v33 = vpop.f32.mrf.mxu2  ;;  %v813_v35 = vpop.f32.mrf.mxu3 }
  0xf2   :  { %v407_v56 = vpop.f32.mrf.mxu2  ;;  %v448_v60 = vpop.f32.mrf.mxu3 }
 0x134   :  { %v269_v26 = vpop.f32.mrf.mxu0  ;;  %v289_v27 = vpop.f32.mrf.mxu1 }
 0x135   :  { %v270_v32 = vadd.f32 %v269_v26, %v248_v29 }
 0x137   :  { %v290_v38 = vadd.f32 %v289_v27, %v270_v32 }
 0x13c   :  { %v309_v31 = vpop.f32.mrf.mxu0  ;;  %v329_v36 = vpop.f32.mrf.mxu1 }
 0x13d   :  { %v310_v34 = vadd.f32 %v309_v31, %v249_v30 }
 0x13f   :  { %v330_v37 = vadd.f32 %v329_v36, %v310_v34 }
 0x141   :  { %v456_v39 = vrot.slane %v330_v37, 7 }
 0x143   :  { %v458_v40 = vsel %vm457_vm0, %v290_v38, %v456_v39  ;;  %v460_v41 = vsel %vm459_vm1, %v290_v38, %v456_v39  ;;  %v463_v42 = vsel %vm462_vm2, %v290_v38, %v456_v39  ;;  %v466_v43 = vsel %vm465_vm3, %v290_v38, %v456_v39 }
 0x144   :  { %v461_v44 = vrot.slane %v460_v41, 1  ;;  %v464_v45 = vrot.slane %v463_v42, 2  ;;  %v467_v46 = vrot.slane %v466_v43, 3  ;;  %v469_v47 = vsel %vm468_vm4, %v290_v38, %v456_v39 }
 0x145   :  { %v472_v48 = vsel %vm471_vm5, %v290_v38, %v456_v39  ;;  %v480_v49 = vperm.slane %v458_v40, 0  ;;  %v481_v50 = vperm.slane %v458_v40, 1  ;;  %v470_v51 = vrot.slane %v469_v47, 4 }
 0x146   :  { %v482_v52 = vperm.slane %v461_v44, 0  ;;  %v483_v53 = vperm.slane %v461_v44, 1  ;;  %v484_v54 = vperm.slane %v464_v45, 0  ;;  %v485_v55 = vperm.slane %v464_v45, 1 }
 0x147   :  { %v473_v57 = vrot.slane %v472_v48, 5  ;;  %v486_v58 = vperm.slane %v467_v46, 0  ;;  %v512_v59 = vadd.f32 %v480_v49, %v389_v16  ;;  %v487_v61 = vperm.slane %v467_v46, 1 }
 0x148   :  { %v513_v62 = vadd.f32 %v481_v50, %v430_v17  ;;  %v514_v63 = vadd.f32 %v482_v52, %v392_v18  ;;  %v515_v0 = vadd.f32 %v483_v53, %v433_v19  ;;  %v488_v1 = vperm.slane %v470_v51, 0 }
 0x149   :  { %v516_v2 = vadd.f32 %v484_v54, %v395_v20  ;;  %528 = vst [vmem:[#allocation11] sm:$0xff] %v512_v59  ;;  %v489_v3 = vperm.slane %v470_v51, 1  ;;  %v517_v4 = vadd.f32 %v485_v55, %v436_v21  ;;  %v475_v5 = vsel %vm474_vm6, %v290_v38, %v456_v39  ;;  %v410_v20 = vpop.f32.mrf.mxu2 }
 0x14a   :  { %529 = vst [vmem:[#allocation11 + $0x8] sm:$0xff] %v513_v62  ;;  %v490_v6 = vperm.slane %v473_v57, 0  ;;  %v518_v7 = vadd.f32 %v486_v58, %v398_v22  ;;  %v476_v8 = vrot.slane %v475_v5, 6  ;;  %v478_v9 = vsel %vm477_vm7, %v456_v39, %v290_v38 }
 0x14b   :  { %530 = vst [vmem:[#allocation11 + $0x10] sm:$0xff] %v514_v63  ;;  %v491_v10 = vperm.slane %v473_v57, 1  ;;  %v519_v11 = vadd.f32 %v487_v61, %v804_v23  ;;  %v479_v12 = vrot.slane %v478_v9, 7  ;;  %v520_v13 = vadd.f32 %v488_v1, %v806_v24  ;;  %v451_v23 = vpop.f32.mrf.mxu3 }
 0x14c   :  { %531 = vst [vmem:[#allocation11 + $0x18] sm:$0xff] %v515_v0  ;;  %v492_v14 = vperm.slane %v476_v8, 0  ;;  %v521_v15 = vadd.f32 %v489_v3, %v808_v25  ;;  %v493_v16 = vperm.slane %v476_v8, 1  ;;  %v522_v17 = vadd.f32 %v490_v6, %v404_v33 }
 0x14d   :  { %532 = vst [vmem:[#allocation11 + $0x20] sm:$0xff] %v516_v2  ;;  %v494_v18 = vperm.slane %v479_v12, 0  ;;  %v523_v19 = vadd.f32 %v491_v10, %v813_v35  ;;  %v495_v21 = vperm.slane %v479_v12, 1 }
 0x14e   :  { %533 = vst [vmem:[#allocation11 + $0x28] sm:$0xff] %v517_v4  ;;  %v524_v22 = vadd.f32 %v492_v14, %v407_v56  ;;  %v525_v26 = vadd.f32 %v493_v16, %v448_v60 }
 0x14f   :  { %534 = vst [vmem:[#allocation11 + $0x30] sm:$0xff] %v518_v7  ;;  %v526_v24 = vadd.f32 %v494_v18, %v410_v20  ;;  %v527_v25 = vadd.f32 %v495_v21, %v451_v23 }
 0x150   :  { %535 = vst [vmem:[#allocation11 + $0x38] sm:$0xff] %v519_v11 }
 0x151   :  { %536 = vst [vmem:[#allocation11 + $0x40] sm:$0xff] %v520_v13 }
 0x152   :  { %537 = vst [vmem:[#allocation11 + $0x48] sm:$0xff] %v521_v15 }
 0x153   :  { %538 = vst [vmem:[#allocation11 + $0x50] sm:$0xff] %v522_v17 }
 0x154   :  { %539 = vst [vmem:[#allocation11 + $0x58] sm:$0xff] %v523_v19 }
 0x155   :  { %540 = vst [vmem:[#allocation11 + $0x60] sm:$0xff] %v524_v22 }
 0x156   :  { %541 = vst [vmem:[#allocation11 + $0x68] sm:$0xff] %v525_v26 }
 0x157   :  { %542 = vst [vmem:[#allocation11 + $0x70] sm:$0xff] %v526_v24 }
 0x158   :  { %543 = vst [vmem:[#allocation11 + $0x78] sm:$0xff] %v527_v25 }
 0x159   :  { %556 = dma.vmem_to_hbm [thread:$0]  %s549_s28, 2048, %s551_s8, [#allocation4], %s729_s1, %s729_s1, %s730_s14  }
 0x15a   :  { %725 = dma.done.wait [#allocation4], 2048  }
 0x15b   :  { %726 = vsyncadd [#allocation4], 4294965248 }
 0x15c   :  { %561 = vsyncpa [#allocation3], 1 }
 0x15d   :  { %562 = vsyncpa [#allocation6], 1 }
 0x15e   :  { %563 = vsyncpa [#allocation9], 1 }
 0x15f   :  { %564 = vsyncpa [#allocation4], 1 }

</bundles_post_ra>
